<compile_context>
chip_gen: v6e
topology: v6e:2x2x1
jax: 0.10.0
libtpu: 0.0.40
codegen_flags: <defaults>
</compile_context>

<pallas_src>
from collections import namedtuple

import jax
import jax.numpy as jnp
from jax.experimental import pallas as pl
from jax.experimental.pallas import tpu as pltpu

Genotype = namedtuple("Genotype", "normal normal_concat")

GENOTYPE = Genotype(
    normal=[
        ("skip_connect", 0), ("avg_pool_3x3", 1),
        ("max_pool_3x3", 0), ("skip_connect", 1),
        ("avg_pool_3x3", 2), ("skip_connect", 3),
        ("skip_connect", 2), ("max_pool_3x3", 1),
    ],
    normal_concat=[2, 3, 4, 5],
)

_NEG = -1e30                              # effectively -inf for max-pool edges
_EXACT = jax.lax.Precision.HIGHEST        # tight f32 conv matmuls


# ----------------------------------------------------------------------------
# Single fused kernel for the whole Cell forward
# ----------------------------------------------------------------------------
def _make_cell_kernel(op_names, indices, concat, H, W, C):
    """One grid step == one batch image.  In-kernel state layout is (H, W*C)
    with lane index = w*C + c (lane-dense: 128 lanes for the test shape)."""
    WC = W * C
    steps = len(op_names) // 2

    def kernel(s0_ref, s1_ref, w0_ref, b0_ref, w1_ref, b1_ref, inv_ref, o_ref):
        lane = jax.lax.broadcasted_iota(jnp.int32, (H, WC), 1)
        row = jax.lax.broadcasted_iota(jnp.int32, (H, WC), 0)
        w_last = lane >= (W - 1) * C             # w == W-1
        w_first = lane < C                       # w == 0
        h_last = row == H - 1
        h_first = row == 0

        def rcb(x_ref, w_ref, b_ref):
            # fused ReLU -> 1x1 conv (block-diag MXU matmul) -> folded BN shift
            x = jnp.maximum(x_ref[0], 0.0)
            y = jnp.dot(x, w_ref[...], preferred_element_type=jnp.float32,
                        precision=_EXACT)
            return y + b_ref[...]

        # Neighbour fetches via XLU rotations (circular); boundary masks kill
        # the wrapped values.  result[h, w] = x[h, w+1], x[h, w-1], x[h+1, w],
        # x[h-1, w] respectively.
        def from_w_plus1(x):
            return pltpu.roll(x, shift=WC - C, axis=1)

        def from_w_minus1(x):
            return pltpu.roll(x, shift=C, axis=1)

        def from_h_plus1(x):
            return pltpu.roll(x, shift=H - 1, axis=0)

        def from_h_minus1(x):
            return pltpu.roll(x, shift=1, axis=0)

        def avg_pool_3x3(x):        # count_include_pad=False via precomputed 1/cnt
            sw = (x
                  + jnp.where(w_last, 0.0, from_w_plus1(x))
                  + jnp.where(w_first, 0.0, from_w_minus1(x)))
            s = (sw
                 + jnp.where(h_last, 0.0, from_h_plus1(sw))
                 + jnp.where(h_first, 0.0, from_h_minus1(sw)))
            return s * inv_ref[...]

        def max_pool_3x3(x):
            xw = jnp.maximum(
                x,
                jnp.maximum(jnp.where(w_last, _NEG, from_w_plus1(x)),
                            jnp.where(w_first, _NEG, from_w_minus1(x))))
            return jnp.maximum(
                xw,
                jnp.maximum(jnp.where(h_last, _NEG, from_h_plus1(xw)),
                            jnp.where(h_first, _NEG, from_h_minus1(xw))))

        def apply_op(name, x):
            if name == "skip_connect":
                return x
            if name == "avg_pool_3x3":
                return avg_pool_3x3(x)
            if name == "max_pool_3x3":
                return max_pool_3x3(x)
            raise NotImplementedError(name)

        s0 = rcb(s0_ref, w0_ref, b0_ref)
        s1 = rcb(s1_ref, w1_ref, b1_ref)
        states = [s0, s1]
        for i in range(steps):
            h1 = apply_op(op_names[2 * i], states[indices[2 * i]])
            h2 = apply_op(op_names[2 * i + 1], states[indices[2 * i + 1]])
            states.append(h1 + h2)               # drop_path is a no-op in eval mode
        for j, idx in enumerate(concat):         # concat = distinct slots of o_ref
            o_ref[0, j] = states[idx]

    return kernel


# ----------------------------------------------------------------------------
# Cell (parameters initialized deterministically in-script)
# ----------------------------------------------------------------------------
def _make_relu_conv_bn_params(key, c_in, c_out, eps=1e-5):
    k1, k2, k3, k4, k5 = jax.random.split(key, 5)
    w = 0.1 * jax.random.normal(k1, (c_in, c_out), jnp.float32)       # conv1x1 (Cin, Cout)
    gamma = 1.0 + 0.1 * jax.random.normal(k2, (c_out,), jnp.float32)
    beta = 0.1 * jax.random.normal(k3, (c_out,), jnp.float32)
    running_mean = 0.1 * jax.random.normal(k4, (c_out,), jnp.float32)
    running_var = 1.0 + 0.1 * jax.random.uniform(k5, (c_out,), jnp.float32)
    scale = gamma / jnp.sqrt(running_var + eps)                       # fold BN (eval)
    shift = beta - running_mean * scale
    return dict(w=w, scale=scale, shift=shift)


class Cell:
    def __init__(self, genotype, C_prev_prev, C_prev, C, rate, key):
        assert rate == 1 and C_prev_prev == C
        # TODO(synk): FactorizedReduce (rate==2), FactorizedIncrease (rate==0) and
        # Resize_bilinear (C_prev_prev != C) preprocess branches are not implemented.
        k0, k1 = jax.random.split(key)
        self.pre0 = _make_relu_conv_bn_params(k0, C_prev_prev, C)
        self.pre1 = _make_relu_conv_bn_params(k1, C_prev, C)
        op_names, indices = zip(*genotype.normal)
        assert len(op_names) == len(indices)
        self._steps = len(op_names) // 2
        self._concat = list(genotype.normal_concat)
        self.multiplier = len(self._concat)
        self._op_names = op_names
        self._indices = indices
        self.C = C
        self.training = False

    def __call__(self, s0, s1, drop_prob=0.0):
        N, C0, H, W = s0.shape
        _, C1, _, _ = s1.shape
        C = self.C
        WC = W * C
        n_out = self.multiplier

        # -------- XLA glue (tiny): lane-dense layouts + folded constants --------
        s0f = jnp.transpose(s0, (0, 2, 3, 1)).reshape(N, H, W * C0)   # NCHW -> (N,H,W*Cin)
        s1f = jnp.transpose(s1, (0, 2, 3, 1)).reshape(N, H, W * C1)

        eye_w = jnp.eye(W, dtype=jnp.float32)
        w0b = jnp.kron(eye_w, self.pre0["w"] * self.pre0["scale"][None, :])
        w1b = jnp.kron(eye_w, self.pre1["w"] * self.pre1["scale"][None, :])
        b0 = jnp.tile(self.pre0["shift"], W).reshape(1, WC)
        b1 = jnp.tile(self.pre1["shift"], W).reshape(1, WC)

        # avg-pool reciprocal divisor (count_include_pad=False), tiled over channels
        cnt = jax.lax.reduce_window(jnp.ones((H, W), jnp.float32), 0.0, jax.lax.add,
                                    (3, 3), (1, 1), ((1, 1), (1, 1)))
        inv = jnp.repeat(1.0 / cnt, C, axis=1)                        # (H, W*C)

        kernel = _make_cell_kernel(self._op_names, self._indices, self._concat, H, W, C)
        bcast = lambda n: (0, 0)

        out = pl.pallas_call(
            kernel,
            out_shape=jax.ShapeDtypeStruct((N, n_out, H, WC), jnp.float32),
            grid=(N,),
            in_specs=[
                pl.BlockSpec((1, H, W * C0), lambda n: (n, 0, 0)),
                pl.BlockSpec((1, H, W * C1), lambda n: (n, 0, 0)),
                pl.BlockSpec((W * C0, WC), bcast),
                pl.BlockSpec((1, WC), bcast),
                pl.BlockSpec((W * C1, WC), bcast),
                pl.BlockSpec((1, WC), bcast),
                pl.BlockSpec((H, WC), bcast),
            ],
            out_specs=pl.BlockSpec((1, n_out, H, WC), lambda n: (n, 0, 0, 0)),
            compiler_params=pltpu.CompilerParams(
                dimension_semantics=("parallel",)),
        )(s0f, s1f, w0b, b0, w1b, b1, inv)

        # -------- XLA glue: (N, n_out, H, W*C) -> NCHW concat layout --------
        out = out.reshape(N, n_out, H, W, C)
        out = jnp.transpose(out, (0, 1, 4, 2, 3)).reshape(N, n_out * C, H, W)
        return out


# ----------------------------------------------------------------------------
# Pure-JAX reference (for correctness check only)
# ----------------------------------------------------------------------------
def _ref_relu_conv_bn(x, p):
    y = jnp.einsum("nchw,cd->ndhw", jnp.maximum(x, 0.0), p["w"],
                   precision=jax.lax.Precision.HIGHEST)
    return y * p["scale"][None, :, None, None] + p["shift"][None, :, None, None]


def _ref_avg_pool(x):
    pad = ((0, 0), (0, 0), (1, 1), (1, 1))
    s = jax.lax.reduce_window(x, 0.0, jax.lax.add, (1, 1, 3, 3), (1, 1, 1, 1), pad)
    cnt = jax.lax.reduce_window(jnp.ones_like(x), 0.0, jax.lax.add,
                                (1, 1, 3, 3), (1, 1, 1, 1), pad)
    return s / cnt


def _ref_max_pool(x):
    pad = ((0, 0), (0, 0), (1, 1), (1, 1))
    return jax.lax.reduce_window(x, -jnp.inf, jax.lax.max, (1, 1, 3, 3), (1, 1, 1, 1), pad)


def ref_cell_forward(cell, s0, s1):
    ops = {"skip_connect": lambda x: x, "avg_pool_3x3": _ref_avg_pool,
           "max_pool_3x3": _ref_max_pool}
    s0 = _ref_relu_conv_bn(s0, cell.pre0)
    s1 = _ref_relu_conv_bn(s1, cell.pre1)
    states = [s0, s1]
    for i in range(cell._steps):
        h1 = ops[cell._op_names[2 * i]](states[cell._indices[2 * i]])
        h2 = ops[cell._op_names[2 * i + 1]](states[cell._indices[2 * i + 1]])
        states.append(h1 + h2)
    return jnp.concatenate([states[i] for i in cell._concat], axis=1)


if __name__ == "__main__":
    N, C, H, W = 2, 8, 16, 16        # W*C == 128 -> exactly one lane-row per state row
    key = jax.random.PRNGKey(0)
    k_s0, k_s1, k_params = jax.random.split(key, 3)
    s0 = jax.random.normal(k_s0, (N, C, H, W), jnp.float32)
    s1 = jax.random.normal(k_s1, (N, C, H, W), jnp.float32)

    cell = Cell(GENOTYPE, C_prev_prev=C, C_prev=C, C=C, rate=1, key=k_params)
    fwd = jax.jit(lambda a, b: cell(a, b, drop_prob=0.0))
    out = jax.block_until_ready(fwd(s0, s1))

    assert out.shape == (N, C * cell.multiplier, H, W), out.shape
    ref = ref_cell_forward(cell, s0, s1)
    err = float(jnp.max(jnp.abs(out - ref)))
    assert jnp.allclose(out, ref, atol=1e-3, rtol=1e-3), f"max abs err {err}"
    print("KERNEL_OK")
</pallas_src>

<mosaic_0001>
module attributes {stable_mosaic.version = 11 : i64} {
  func.func @kernel(%arg0: i32, %arg1: memref<1x16x128xf32, #tpu.memory_space<vmem>>, %arg2: memref<1x16x128xf32, #tpu.memory_space<vmem>>, %arg3: memref<128x128xf32, #tpu.memory_space<vmem>>, %arg4: memref<1x128xf32, #tpu.memory_space<vmem>>, %arg5: memref<128x128xf32, #tpu.memory_space<vmem>>, %arg6: memref<1x128xf32, #tpu.memory_space<vmem>>, %arg7: memref<16x128xf32, #tpu.memory_space<vmem>>, %arg8: memref<1x4x16x128xf32, #tpu.memory_space<vmem>>) attributes {dimension_semantics = [#tpu.dimension_semantics<parallel>], iteration_bounds = array<i64: 2>, scalar_prefetch = 0 : i64, scratch_operands = 0 : i64, tpu.core_type = #tpu.core_type<tc>, window_params = [{transform_indices = @transform_0, window_bounds = array<i64: 1, 16, 128>}, {transform_indices = @transform_1, window_bounds = array<i64: 1, 16, 128>}, {pipeline_mode = #tpu.pipeline_mode<synchronous>, transform_indices = @transform_2, window_bounds = array<i64: 128, 128>}, {pipeline_mode = #tpu.pipeline_mode<synchronous>, transform_indices = @transform_3, window_bounds = array<i64: 1, 128>}, {pipeline_mode = #tpu.pipeline_mode<synchronous>, transform_indices = @transform_4, window_bounds = array<i64: 128, 128>}, {pipeline_mode = #tpu.pipeline_mode<synchronous>, transform_indices = @transform_5, window_bounds = array<i64: 1, 128>}, {pipeline_mode = #tpu.pipeline_mode<synchronous>, transform_indices = @transform_6, window_bounds = array<i64: 16, 128>}, {transform_indices = @transform_7, window_bounds = array<i64: 1, 4, 16, 128>}]} {
    %0 = tpu.iota {dimensions = array<i32: 1>} : vector<16x128xi32>
    %1 = tpu.iota {dimensions = array<i32: 0>} : vector<16x128xi32>
    %c120_i32 = arith.constant 120 : i32
    %2 = vector.broadcast %c120_i32 : i32 to vector<16x128xi32>
    %3 = arith.cmpi sge, %0, %2 : vector<16x128xi32>
    %c8_i32 = arith.constant 8 : i32
    %4 = vector.broadcast %c8_i32 : i32 to vector<16x128xi32>
    %5 = arith.cmpi slt, %0, %4 : vector<16x128xi32>
    %c15_i32 = arith.constant 15 : i32
    %6 = vector.broadcast %c15_i32 : i32 to vector<16x128xi32>
    %7 = arith.cmpi eq, %1, %6 : vector<16x128xi32>
    %c0_i32 = arith.constant 0 : i32
    %8 = vector.broadcast %c0_i32 : i32 to vector<16x128xi32>
    %9 = arith.cmpi eq, %1, %8 : vector<16x128xi32>
    %c0 = arith.constant 0 : index
    %c0_0 = arith.constant 0 : index
    %c0_1 = arith.constant 0 : index
    %10 = vector.load %arg1[%c0, %c0_0, %c0_1] : memref<1x16x128xf32, #tpu.memory_space<vmem>>, vector<1x16x128xf32>
    %11 = vector.shape_cast %10 : vector<1x16x128xf32> to vector<16x128xf32>
    %cst = arith.constant 0.000000e+00 : f32
    %12 = vector.broadcast %cst : f32 to vector<16x128xf32>
    %13 = arith.maximumf %11, %12 : vector<16x128xf32>
    %c0_2 = arith.constant 0 : index
    %c0_3 = arith.constant 0 : index
    %14 = vector.load %arg3[%c0_2, %c0_3] : memref<128x128xf32, #tpu.memory_space<vmem>>, vector<128x128xf32>
    %cst_4 = arith.constant dense<0.000000e+00> : vector<16x128xf32>
    %15 = tpu.matmul %13, %14, %cst_4 {dimension_numbers = #tpu.dot_dimension_numbers<[1], [0], [0], [1], [0, 0, 1, 1], [], []>, precision = #tpu.contract_precision<fp32>} : vector<16x128xf32>, vector<128x128xf32>, vector<16x128xf32> -> vector<16x128xf32>
    %c0_5 = arith.constant 0 : index
    %c0_6 = arith.constant 0 : index
    %16 = vector.load %arg4[%c0_5, %c0_6] : memref<1x128xf32, #tpu.memory_space<vmem>>, vector<1x128xf32>
    %17 = vector.broadcast %16 : vector<1x128xf32> to vector<16x128xf32>
    %18 = arith.addf %15, %17 : vector<16x128xf32>
    %c0_7 = arith.constant 0 : index
    %c0_8 = arith.constant 0 : index
    %c0_9 = arith.constant 0 : index
    %19 = vector.load %arg2[%c0_7, %c0_8, %c0_9] : memref<1x16x128xf32, #tpu.memory_space<vmem>>, vector<1x16x128xf32>
    %20 = vector.shape_cast %19 : vector<1x16x128xf32> to vector<16x128xf32>
    %cst_10 = arith.constant 0.000000e+00 : f32
    %21 = vector.broadcast %cst_10 : f32 to vector<16x128xf32>
    %22 = arith.maximumf %20, %21 : vector<16x128xf32>
    %c0_11 = arith.constant 0 : index
    %c0_12 = arith.constant 0 : index
    %23 = vector.load %arg5[%c0_11, %c0_12] : memref<128x128xf32, #tpu.memory_space<vmem>>, vector<128x128xf32>
    %cst_13 = arith.constant dense<0.000000e+00> : vector<16x128xf32>
    %24 = tpu.matmul %22, %23, %cst_13 {dimension_numbers = #tpu.dot_dimension_numbers<[1], [0], [0], [1], [0, 0, 1, 1], [], []>, precision = #tpu.contract_precision<fp32>} : vector<16x128xf32>, vector<128x128xf32>, vector<16x128xf32> -> vector<16x128xf32>
    %c0_14 = arith.constant 0 : index
    %c0_15 = arith.constant 0 : index
    %25 = vector.load %arg6[%c0_14, %c0_15] : memref<1x128xf32, #tpu.memory_space<vmem>>, vector<1x128xf32>
    %26 = vector.broadcast %25 : vector<1x128xf32> to vector<16x128xf32>
    %27 = arith.addf %24, %26 : vector<16x128xf32>
    %c120_i32_16 = arith.constant 120 : i32
    %28 = tpu.dynamic_rotate %27 by %c120_i32_16 dim 1 : vector<16x128xf32>, i32 -> vector<16x128xf32>
    %cst_17 = arith.constant 0.000000e+00 : f32
    %29 = vector.broadcast %cst_17 : f32 to vector<16x128xf32>
    %30 = arith.select %3, %29, %28 : vector<16x128xi1>, vector<16x128xf32>
    %31 = arith.addf %27, %30 : vector<16x128xf32>
    %c8_i32_18 = arith.constant 8 : i32
    %32 = tpu.dynamic_rotate %27 by %c8_i32_18 dim 1 : vector<16x128xf32>, i32 -> vector<16x128xf32>
    %cst_19 = arith.constant 0.000000e+00 : f32
    %33 = vector.broadcast %cst_19 : f32 to vector<16x128xf32>
    %34 = arith.select %5, %33, %32 : vector<16x128xi1>, vector<16x128xf32>
    %35 = arith.addf %31, %34 : vector<16x128xf32>
    %c15_i32_20 = arith.constant 15 : i32
    %36 = tpu.dynamic_rotate %35 by %c15_i32_20 dim 0 : vector<16x128xf32>, i32 -> vector<16x128xf32>
    %cst_21 = arith.constant 0.000000e+00 : f32
    %37 = vector.broadcast %cst_21 : f32 to vector<16x128xf32>
    %38 = arith.select %7, %37, %36 : vector<16x128xi1>, vector<16x128xf32>
    %39 = arith.addf %35, %38 : vector<16x128xf32>
    %c1_i32 = arith.constant 1 : i32
    %40 = tpu.dynamic_rotate %35 by %c1_i32 dim 0 : vector<16x128xf32>, i32 -> vector<16x128xf32>
    %cst_22 = arith.constant 0.000000e+00 : f32
    %41 = vector.broadcast %cst_22 : f32 to vector<16x128xf32>
    %42 = arith.select %9, %41, %40 : vector<16x128xi1>, vector<16x128xf32>
    %43 = arith.addf %39, %42 : vector<16x128xf32>
    %c0_23 = arith.constant 0 : index
    %c0_24 = arith.constant 0 : index
    %44 = vector.load %arg7[%c0_23, %c0_24] : memref<16x128xf32, #tpu.memory_space<vmem>>, vector<16x128xf32>
    %45 = arith.mulf %43, %44 : vector<16x128xf32>
    %46 = arith.addf %18, %45 : vector<16x128xf32>
    %c120_i32_25 = arith.constant 120 : i32
    %47 = tpu.dynamic_rotate %18 by %c120_i32_25 dim 1 : vector<16x128xf32>, i32 -> vector<16x128xf32>
    %cst_26 = arith.constant -1.000000e+30 : f32
    %48 = vector.broadcast %cst_26 : f32 to vector<16x128xf32>
    %49 = arith.select %3, %48, %47 : vector<16x128xi1>, vector<16x128xf32>
    %c8_i32_27 = arith.constant 8 : i32
    %50 = tpu.dynamic_rotate %18 by %c8_i32_27 dim 1 : vector<16x128xf32>, i32 -> vector<16x128xf32>
    %cst_28 = arith.constant -1.000000e+30 : f32
    %51 = vector.broadcast %cst_28 : f32 to vector<16x128xf32>
    %52 = arith.select %5, %51, %50 : vector<16x128xi1>, vector<16x128xf32>
    %53 = arith.maximumf %49, %52 : vector<16x128xf32>
    %54 = arith.maximumf %18, %53 : vector<16x128xf32>
    %c15_i32_29 = arith.constant 15 : i32
    %55 = tpu.dynamic_rotate %54 by %c15_i32_29 dim 0 : vector<16x128xf32>, i32 -> vector<16x128xf32>
    %cst_30 = arith.constant -1.000000e+30 : f32
    %56 = vector.broadcast %cst_30 : f32 to vector<16x128xf32>
    %57 = arith.select %7, %56, %55 : vector<16x128xi1>, vector<16x128xf32>
    %c1_i32_31 = arith.constant 1 : i32
    %58 = tpu.dynamic_rotate %54 by %c1_i32_31 dim 0 : vector<16x128xf32>, i32 -> vector<16x128xf32>
    %cst_32 = arith.constant -1.000000e+30 : f32
    %59 = vector.broadcast %cst_32 : f32 to vector<16x128xf32>
    %60 = arith.select %9, %59, %58 : vector<16x128xi1>, vector<16x128xf32>
    %61 = arith.maximumf %57, %60 : vector<16x128xf32>
    %62 = arith.maximumf %54, %61 : vector<16x128xf32>
    %63 = arith.addf %62, %27 : vector<16x128xf32>
    %c120_i32_33 = arith.constant 120 : i32
    %64 = tpu.dynamic_rotate %46 by %c120_i32_33 dim 1 : vector<16x128xf32>, i32 -> vector<16x128xf32>
    %cst_34 = arith.constant 0.000000e+00 : f32
    %65 = vector.broadcast %cst_34 : f32 to vector<16x128xf32>
    %66 = arith.select %3, %65, %64 : vector<16x128xi1>, vector<16x128xf32>
    %67 = arith.addf %46, %66 : vector<16x128xf32>
    %c8_i32_35 = arith.constant 8 : i32
    %68 = tpu.dynamic_rotate %46 by %c8_i32_35 dim 1 : vector<16x128xf32>, i32 -> vector<16x128xf32>
    %cst_36 = arith.constant 0.000000e+00 : f32
    %69 = vector.broadcast %cst_36 : f32 to vector<16x128xf32>
    %70 = arith.select %5, %69, %68 : vector<16x128xi1>, vector<16x128xf32>
    %71 = arith.addf %67, %70 : vector<16x128xf32>
    %c15_i32_37 = arith.constant 15 : i32
    %72 = tpu.dynamic_rotate %71 by %c15_i32_37 dim 0 : vector<16x128xf32>, i32 -> vector<16x128xf32>
    %cst_38 = arith.constant 0.000000e+00 : f32
    %73 = vector.broadcast %cst_38 : f32 to vector<16x128xf32>
    %74 = arith.select %7, %73, %72 : vector<16x128xi1>, vector<16x128xf32>
    %75 = arith.addf %71, %74 : vector<16x128xf32>
    %c1_i32_39 = arith.constant 1 : i32
    %76 = tpu.dynamic_rotate %71 by %c1_i32_39 dim 0 : vector<16x128xf32>, i32 -> vector<16x128xf32>
    %cst_40 = arith.constant 0.000000e+00 : f32
    %77 = vector.broadcast %cst_40 : f32 to vector<16x128xf32>
    %78 = arith.select %9, %77, %76 : vector<16x128xi1>, vector<16x128xf32>
    %79 = arith.addf %75, %78 : vector<16x128xf32>
    %c0_41 = arith.constant 0 : index
    %c0_42 = arith.constant 0 : index
    %80 = vector.load %arg7[%c0_41, %c0_42] : memref<16x128xf32, #tpu.memory_space<vmem>>, vector<16x128xf32>
    %81 = arith.mulf %79, %80 : vector<16x128xf32>
    %82 = arith.addf %81, %63 : vector<16x128xf32>
    %c120_i32_43 = arith.constant 120 : i32
    %83 = tpu.dynamic_rotate %27 by %c120_i32_43 dim 1 : vector<16x128xf32>, i32 -> vector<16x128xf32>
    %cst_44 = arith.constant -1.000000e+30 : f32
    %84 = vector.broadcast %cst_44 : f32 to vector<16x128xf32>
    %85 = arith.select %3, %84, %83 : vector<16x128xi1>, vector<16x128xf32>
    %c8_i32_45 = arith.constant 8 : i32
    %86 = tpu.dynamic_rotate %27 by %c8_i32_45 dim 1 : vector<16x128xf32>, i32 -> vector<16x128xf32>
    %cst_46 = arith.constant -1.000000e+30 : f32
    %87 = vector.broadcast %cst_46 : f32 to vector<16x128xf32>
    %88 = arith.select %5, %87, %86 : vector<16x128xi1>, vector<16x128xf32>
    %89 = arith.maximumf %85, %88 : vector<16x128xf32>
    %90 = arith.maximumf %27, %89 : vector<16x128xf32>
    %c15_i32_47 = arith.constant 15 : i32
    %91 = tpu.dynamic_rotate %90 by %c15_i32_47 dim 0 : vector<16x128xf32>, i32 -> vector<16x128xf32>
    %cst_48 = arith.constant -1.000000e+30 : f32
    %92 = vector.broadcast %cst_48 : f32 to vector<16x128xf32>
    %93 = arith.select %7, %92, %91 : vector<16x128xi1>, vector<16x128xf32>
    %c1_i32_49 = arith.constant 1 : i32
    %94 = tpu.dynamic_rotate %90 by %c1_i32_49 dim 0 : vector<16x128xf32>, i32 -> vector<16x128xf32>
    %cst_50 = arith.constant -1.000000e+30 : f32
    %95 = vector.broadcast %cst_50 : f32 to vector<16x128xf32>
    %96 = arith.select %9, %95, %94 : vector<16x128xi1>, vector<16x128xf32>
    %97 = arith.maximumf %93, %96 : vector<16x128xf32>
    %98 = arith.maximumf %90, %97 : vector<16x128xf32>
    %99 = arith.addf %46, %98 : vector<16x128xf32>
    %c0_51 = arith.constant 0 : index
    %c0_52 = arith.constant 0 : index
    %c0_53 = arith.constant 0 : index
    %c0_54 = arith.constant 0 : index
    %100 = vector.load %arg8[%c0_51, %c0_52, %c0_53, %c0_54] : memref<1x4x16x128xf32, #tpu.memory_space<vmem>>, vector<1x1x16x128xf32>
    %101 = vector.shape_cast %100 : vector<1x1x16x128xf32> to vector<16x128xf32>
    %102 = vector.shape_cast %46 : vector<16x128xf32> to vector<1x1x16x128xf32>
    tpu.vector_store %arg8[%c0_51, %c0_52, %c0_53, %c0_54], %102 {strides = array<i32>} : memref<1x4x16x128xf32, #tpu.memory_space<vmem>>, vector<1x1x16x128xf32>,
    %c0_55 = arith.constant 0 : index
    %c1 = arith.constant 1 : index
    %c0_56 = arith.constant 0 : index
    %c0_57 = arith.constant 0 : index
    %103 = vector.load %arg8[%c0_55, %c1, %c0_56, %c0_57] : memref<1x4x16x128xf32, #tpu.memory_space<vmem>>, vector<1x1x16x128xf32>
    %104 = vector.shape_cast %103 : vector<1x1x16x128xf32> to vector<16x128xf32>
    %105 = vector.shape_cast %63 : vector<16x128xf32> to vector<1x1x16x128xf32>
    tpu.vector_store %arg8[%c0_55, %c1, %c0_56, %c0_57], %105 {strides = array<i32>} : memref<1x4x16x128xf32, #tpu.memory_space<vmem>>, vector<1x1x16x128xf32>,
    %c0_58 = arith.constant 0 : index
    %c2 = arith.constant 2 : index
    %c0_59 = arith.constant 0 : index
    %c0_60 = arith.constant 0 : index
    %106 = vector.load %arg8[%c0_58, %c2, %c0_59, %c0_60] : memref<1x4x16x128xf32, #tpu.memory_space<vmem>>, vector<1x1x16x128xf32>
    %107 = vector.shape_cast %106 : vector<1x1x16x128xf32> to vector<16x128xf32>
    %108 = vector.shape_cast %82 : vector<16x128xf32> to vector<1x1x16x128xf32>
    tpu.vector_store %arg8[%c0_58, %c2, %c0_59, %c0_60], %108 {strides = array<i32>} : memref<1x4x16x128xf32, #tpu.memory_space<vmem>>, vector<1x1x16x128xf32>,
    %c0_61 = arith.constant 0 : index
    %c3 = arith.constant 3 : index
    %c0_62 = arith.constant 0 : index
    %c0_63 = arith.constant 0 : index
    %109 = vector.load %arg8[%c0_61, %c3, %c0_62, %c0_63] : memref<1x4x16x128xf32, #tpu.memory_space<vmem>>, vector<1x1x16x128xf32>
    %110 = vector.shape_cast %109 : vector<1x1x16x128xf32> to vector<16x128xf32>
    %111 = vector.shape_cast %99 : vector<16x128xf32> to vector<1x1x16x128xf32>
    tpu.vector_store %arg8[%c0_61, %c3, %c0_62, %c0_63], %111 {strides = array<i32>} : memref<1x4x16x128xf32, #tpu.memory_space<vmem>>, vector<1x1x16x128xf32>,
    return
  }
  func.func @transform_0(%arg0: i32) -> (i32, i32, i32) {
    %c0_i32 = arith.constant 0 : i32
    %c0_i32_0 = arith.constant 0 : i32
    %c0_i32_1 = arith.constant 0 : i32
    return %arg0, %c0_i32, %c0_i32_0 : i32, i32, i32
  }
  func.func @transform_1(%arg0: i32) -> (i32, i32, i32) {
    %c0_i32 = arith.constant 0 : i32
    %c0_i32_0 = arith.constant 0 : i32
    %c0_i32_1 = arith.constant 0 : i32
    return %arg0, %c0_i32, %c0_i32_0 : i32, i32, i32
  }
  func.func @transform_2(%arg0: i32) -> (i32, i32) {
    %c0_i32 = arith.constant 0 : i32
    %c0_i32_0 = arith.constant 0 : i32
    %c0_i32_1 = arith.constant 0 : i32
    return %c0_i32, %c0_i32_0 : i32, i32
  }
  func.func @transform_3(%arg0: i32) -> (i32, i32) {
    %c0_i32 = arith.constant 0 : i32
    %c0_i32_0 = arith.constant 0 : i32
    %c0_i32_1 = arith.constant 0 : i32
    return %c0_i32, %c0_i32_0 : i32, i32
  }
  func.func @transform_4(%arg0: i32) -> (i32, i32) {
    %c0_i32 = arith.constant 0 : i32
    %c0_i32_0 = arith.constant 0 : i32
    %c0_i32_1 = arith.constant 0 : i32
    return %c0_i32, %c0_i32_0 : i32, i32
  }
  func.func @transform_5(%arg0: i32) -> (i32, i32) {
    %c0_i32 = arith.constant 0 : i32
    %c0_i32_0 = arith.constant 0 : i32
    %c0_i32_1 = arith.constant 0 : i32
    return %c0_i32, %c0_i32_0 : i32, i32
  }
  func.func @transform_6(%arg0: i32) -> (i32, i32) {
    %c0_i32 = arith.constant 0 : i32
    %c0_i32_0 = arith.constant 0 : i32
    %c0_i32_1 = arith.constant 0 : i32
    return %c0_i32, %c0_i32_0 : i32, i32
  }
  func.func @transform_7(%arg0: i32) -> (i32, i32, i32, i32) {
    %c0_i32 = arith.constant 0 : i32
    %c0_i32_0 = arith.constant 0 : i32
    %c0_i32_1 = arith.constant 0 : i32
    %c0_i32_2 = arith.constant 0 : i32
    return %arg0, %c0_i32, %c0_i32_0, %c0_i32_1 : i32, i32, i32, i32
  }
}

</mosaic_0001>

<bundles_post_ra>
// kernel: tile.10
= control target key start
LH: loop header
LB: loop body
LE: loop exit
PB: predicated region body
PF: predicated region fallthrough
CT: control target
= control target key end

     0   :  { %s28_s0 = inlined_call_operand.vmem [shape: f32[8], index: 0, kind: input, shape index: {}]   ;;  %s29_s1 = inlined_call_operand.vmem [shape: f32[16,8], index: 1, kind: output, shape index: {}]  }
   0x1   :  { %v4_v0 = vld [vmem:[%s28_s0] ss:$0 sm:$0xff] }
   0x2   :  { %5 = vst [vmem:[%s29_s1] sm:$0xff] %v4_v0  ;;  %8 = vst [vmem:[%s29_s1 + $0x8] sm:$0xff] %v4_v0 }

// kernel: tile.11
= control target key start
LH: loop header
LB: loop body
LE: loop exit
PB: predicated region body
PF: predicated region fallthrough
CT: control target
= control target key end

     0   :  { %s133_s10 = smov 120   ;;  %s134_s11 = smov 104   ;;  %vm3_vm0 = vcmask 64512   ;;  %vm9_vm1 = vcmask 1048512   ;;  %vm15_vm2 = vcmask 982912   ;;  %vm21_vm3 = vcmask 917312   ;;  %s209_s0 = inlined_call_operand.vmem [shape: f32[16,8], index: 0, kind: input, shape index: {}]   ;;  %s210_s1 = inlined_call_operand.vmem [shape: f32[1,128], index: 1, kind: output, shape index: {}]  }
   0x1   :  { %v103_v0 = vld [vmem:[%s209_s0 + $0xf] sm:$0x1]   ;;  %v105_v1 = vld [vmem:[%s209_s0 + $0xd] sm:$0x1]   ;;  %v104_v2 = vld [vmem:[%s209_s0 + $0xe] sm:$0x1]  }
   0x2   :  { %7 = vrot.lane.b32.xlu0 %v103_v0, %s133_s10  ;;  %19 = vrot.lane.b32.xlu1 %v105_v1, %s134_s11  ;;  %v106_v3 = vld [vmem:[%s209_s0 + $0xc] sm:$0x1]   ;;  %s135_s16 = smov 112   ;;  %s136_s17 = smov 96   ;;  %v107_v4 = vld [vmem:[%s209_s0 + $0xb] sm:$0x1]  }
   0x3   :  { %v108_v5 = vld [vmem:[%s209_s0 + $0xa] sm:$0x1]   ;;  %v2_v6 = vld [vmem:[%s209_s0] sm:$0x1]   ;;  %s137_s24 = smov 88   ;;  %s138_s25 = smov 80  }
   0x4   :  { %4 = vst.msk [vmem:[#allocation0] sm:$0x1] %vm3_vm0, %v2_v6   ;;  %v109_v7 = vld [vmem:[%s209_s0 + $0x9] sm:$0x1]   ;;  %v110_v8 = vld [vmem:[%s209_s0 + $0x8] sm:$0x1]  }
   0x5   :  { %s139_s30 = smov 72   ;;  %s140_s2 = smov 64   ;;  %v111_v9 = vld [vmem:[%s209_s0 + $0x7] sm:$0x1]   ;;  %v112_v10 = vld [vmem:[%s209_s0 + $0x6] sm:$0x1]  }
   0x6   :  { %13 = vrot.lane.b32.xlu0 %v104_v2, %s135_s16  ;;  %25 = vrot.lane.b32.xlu1 %v106_v3, %s136_s17  ;;  %s141_s7 = smov 56   ;;  %s142_s8 = smov 48   ;;  %v113_v11 = vld [vmem:[%s209_s0 + $0x5] sm:$0x1]   ;;  %v114_v12 = vld [vmem:[%s209_s0 + $0x4] sm:$0x1]  }
   0x7   :  { %s143_s13 = smov 40   ;;  %s144_s14 = smov 32   ;;  %v115_v13 = vld [vmem:[%s209_s0 + $0x3] sm:$0x1]   ;;  %v116_v14 = vld [vmem:[%s209_s0 + $0x2] sm:$0x1]  }
   0x8   :  { %s145_s19 = smov 24   ;;  %s146_s20 = smov 16   ;;  %v117_v15 = vld [vmem:[%s209_s0 + $0x1] sm:$0x1]   ;;  %vm27_vm4 = vcmask 851712   ;;  %vm33_vm5 = vcmask 786112  }
   0x9   :  { %s147_s0 = smov 8   ;;  %vm39_vm6 = vcmask 720512   ;;  %vm45_vm7 = vcmask 654912   ;;  %vm51_vm8 = vcmask 589312   ;;  %vm57_vm9 = vcmask 523712  }
   0xa   :  { %31 = vrot.lane.b32.xlu0 %v107_v4, %s137_s24  ;;  %37 = vrot.lane.b32.xlu1 %v108_v5, %s138_s25  ;;  %vm63_vm10 = vcmask 458112   ;;  %vm69_vm11 = vcmask 392512   ;;  %vm75_vm12 = vcmask 326912   ;;  %vm81_vm13 = vcmask 261312  }
   0xb   :  { %vm87_vm14 = vcmask 195712   ;;  %vm93_vm15 = vcmask 130112  }
   0xe   :  { %43 = vrot.lane.b32.xlu0 %v109_v7, %s139_s30  ;;  %49 = vrot.lane.b32.xlu1 %v110_v8, %s140_s2 }
  0x12   :  { %55 = vrot.lane.b32.xlu0 %v111_v9, %s141_s7  ;;  %61 = vrot.lane.b32.xlu1 %v112_v10, %s142_s8 }
  0x16   :  { %67 = vrot.lane.b32.xlu0 %v113_v11, %s143_s13  ;;  %73 = vrot.lane.b32.xlu1 %v114_v12, %s144_s14 }
  0x1a   :  { %79 = vrot.lane.b32.xlu0 %v115_v13, %s145_s19  ;;  %85 = vrot.lane.b32.xlu1 %v116_v14, %s146_s20 }
  0x1e   :  { %91 = vrot.lane.b32.xlu0 %v117_v15, %s147_s0 }
  0x74   :  { %v8_v16 = vpop.permute.xlu0 %7   ;;  %v20_v17 = vpop.permute.xlu1 %19  }
  0x75   :  { %10 = vst.msk [vmem:[#allocation0] sm:$0x1] %vm9_vm1, %v8_v16  }
  0x78   :  { %v14_v18 = vpop.permute.xlu0 %13   ;;  %v26_v19 = vpop.permute.xlu1 %25  }
  0x79   :  { %16 = vst.msk [vmem:[#allocation0] sm:$0x1] %vm15_vm2, %v14_v18  }
  0x7a   :  { %22 = vst.msk [vmem:[#allocation0] sm:$0x1] %vm21_vm3, %v20_v17  }
  0x7b   :  { %28 = vst.msk [vmem:[#allocation0] sm:$0x1] %vm27_vm4, %v26_v19  }
  0x7c   :  { %v32_v20 = vpop.permute.xlu0 %31   ;;  %v38_v21 = vpop.permute.xlu1 %37  }
  0x7d   :  { %34 = vst.msk [vmem:[#allocation0] sm:$0x1] %vm33_vm5, %v32_v20  }
  0x7e   :  { %40 = vst.msk [vmem:[#allocation0] sm:$0x1] %vm39_vm6, %v38_v21  }
  0x80   :  { %v44_v22 = vpop.permute.xlu0 %43   ;;  %v50_v23 = vpop.permute.xlu1 %49  }
  0x81   :  { %46 = vst.msk [vmem:[#allocation0] sm:$0x1] %vm45_vm7, %v44_v22  }
  0x82   :  { %52 = vst.msk [vmem:[#allocation0] sm:$0x1] %vm51_vm8, %v50_v23  }
  0x84   :  { %v56_v24 = vpop.permute.xlu0 %55   ;;  %v62_v25 = vpop.permute.xlu1 %61  }
  0x85   :  { %58 = vst.msk [vmem:[#allocation0] sm:$0x1] %vm57_vm9, %v56_v24  }
  0x86   :  { %64 = vst.msk [vmem:[#allocation0] sm:$0x1] %vm63_vm10, %v62_v25  }
  0x88   :  { %v68_v26 = vpop.permute.xlu0 %67   ;;  %v74_v27 = vpop.permute.xlu1 %73  }
  0x89   :  { %70 = vst.msk [vmem:[#allocation0] sm:$0x1] %vm69_vm11, %v68_v26  }
  0x8a   :  { %76 = vst.msk [vmem:[#allocation0] sm:$0x1] %vm75_vm12, %v74_v27  }
  0x8c   :  { %v80_v28 = vpop.permute.xlu0 %79   ;;  %v86_v29 = vpop.permute.xlu1 %85  }
  0x8d   :  { %82 = vst.msk [vmem:[#allocation0] sm:$0x1] %vm81_vm13, %v80_v28  }
  0x8e   :  { %88 = vst.msk [vmem:[#allocation0] sm:$0x1] %vm87_vm14, %v86_v29  }
  0x90   :  { %v92_v30 = vpop.permute.xlu0 %91  }
  0x91   :  { %94 = vst.msk [vmem:[#allocation0] sm:$0x1] %vm93_vm15, %v92_v30  }
  0x98   :  { %v99_v31 = vld [vmem:[#allocation0] sm:$0x1] }
  0x99   :  { %102 = vst [vmem:[%s210_s1] sm:$0x1] %v99_v31 }

// kernel: _lambda_.1
= control target key start
LH: loop header
LB: loop body
LE: loop exit
PB: predicated region body
PF: predicated region fallthrough
CT: control target
= control target key end

     0   :  { %s2666_s24 = smov 0   ;;  %s3660_s0 = inlined_call_operand.vmem [shape: f32[2,16,128], index: 0, kind: input, shape index: {}]   ;;  %s3661_s1 = inlined_call_operand.vmem [shape: f32[2,16,128], index: 1, kind: input, shape index: {}]   ;;  %s3662_s2 = inlined_call_operand.vmem [shape: f32[128,128], index: 2, kind: input, shape index: {}]   ;;  %s3663_s3 = inlined_call_operand.vmem [shape: f32[1,128], index: 3, kind: input, shape index: {}]   ;;  %s3664_s4 = inlined_call_operand.vmem [shape: f32[128,128], index: 4, kind: input, shape index: {}]   ;;  %s3665_s5 = inlined_call_operand.vmem [shape: f32[1,128], index: 5, kind: input, shape index: {}]   ;;  %s3666_s6 = inlined_call_operand.vmem [shape: f32[16,128], index: 6, kind: input, shape index: {}]   ;;  %s3667_s7 = inlined_call_operand.vmem [shape: f32[2,4,16,128], index: 7, kind: output, shape index: {}]  }
   0x1 LB: > { %s1946_s25 = sadd.s32 4294967295, %s2622_s24   ;;  %p1950_p0 = scmp.ge.s32.totalorder %s2622_s24, 1  ;;  %s2622_s24 = sphi %s2666_s24, %s17_s24  }
   0x2   : > { %p247_p1 = scmp.lt.s32.totalorder %s2622_s24, 3 }
   0x4   : > { %p248_p2 = pnand %p1950_p0, %p247_p1 }
   0x5   : > { %p2683_p3 = scmp.lt.s32.totalorder (!%p248_p2), %s1946_s25, 1  ;;  %s2624_s17 = smov (!%p248_p2), 8  }
   0x6   : > { %251 = sbr.rel (%p248_p2) target bundleno = 693 (0x2b5), region = 48  ;;  %s2625_s18 = smov (!%p248_p2), 120  }
   0xb   : > { %v329_v0 = vld [vmem:[%s3662_s2 + $0x78] sm:$0xff]  ;;  %v328_v1 = vld [vmem:[%s3662_s2 + $0x70] sm:$0xff]  ;;  %v327_v2 = vld [vmem:[%s3662_s2 + $0x68] sm:$0xff]  ;;  %s3678_s25 = smov (!%p2683_p3, %s1946_s25), 1 }
   0xc   : > { %v2687_v3 = vand.u32 4294901760, %v329_v0  ;;  %v2689_v4 = vand.u32 4294901760, %v328_v1  ;;  %v2691_v5 = vand.u32 4294901760, %v327_v2  ;;  %v326_v6 = vld [vmem:[%s3662_s2 + $0x60] sm:$0xff]  ;;  %v325_v7 = vld [vmem:[%s3662_s2 + $0x58] sm:$0xff]  ;;  %v324_v8 = vld [vmem:[%s3662_s2 + $0x50] sm:$0xff] }
   0xd   : > { %v2702_v9 = vand.u32 4294901760, %v326_v6  ;;  %v2704_v10 = vand.u32 4294901760, %v325_v7  ;;  %v2706_v11 = vand.u32 4294901760, %v324_v8  ;;  %v323_v12 = vld [vmem:[%s3662_s2 + $0x48] sm:$0xff]  ;;  %v322_v13 = vld [vmem:[%s3662_s2 + $0x40] sm:$0xff]  ;;  %v321_v18 = vld [vmem:[%s3662_s2 + $0x38] sm:$0xff] }
   0xe   : > { %2186 = vmatprep.subr.mxu0 %v2687_v3  ;;  %v2716_v14 = vsub.f32 %v329_v0, %v2687_v3  ;;  %v2719_v15 = vsub.f32 %v328_v1, %v2689_v4  ;;  %v2721_v16 = vand.u32 4294901760, %v323_v12  ;;  %v2724_v17 = vsub.f32 %v327_v2, %v2691_v5  ;;  %s1967_s22 = sshll.u32 %s3678_s25, 4  ;;  %v320_v28 = vld [vmem:[%s3662_s2 + $0x30] sm:$0xff]  ;;  %v319_v35 = vld [vmem:[%s3662_s2 + $0x28] sm:$0xff]  ;;  %v318_v42 = vld [vmem:[%s3662_s2 + $0x20] sm:$0xff] }
   0xf   : > { %2187 = vmatpush3.msra.mxu0 %v2687_v3  ;;  %v2735_v19 = vsub.f32 %v326_v6, %v2702_v9  ;;  %v2738_v20 = vsub.f32 %v325_v7, %v2704_v10  ;;  %v2750_v24 = vand.u32 4294901760, %v322_v13  ;;  %v2757_v26 = vand.u32 4294901760, %v321_v18  ;;  %s288_s8 = scalar_lea.vmem %s3660_s0, %s1967_s22  ;;  %v317_v49 = vld [vmem:[%s3662_s2 + $0x18] sm:$0xff]  ;;  %v316_v60 = vld [vmem:[%s3662_s2 + $0x10] sm:$0xff]  ;;  %v315_v6 = vld [vmem:[%s3662_s2 + $0x8] sm:$0xff]  ;;  %s293_s19 = scalar_lea.vmem %s3661_s1, %s1967_s22 }
  0x10   : > { %2188 = vmatprep.subr.mxu0 %v2689_v4  ;;  %v2742_v21 = vand.u32 4294901760, %v2716_v14  ;;  %v2745_v22 = vand.u32 4294901760, %v2719_v15  ;;  %v2748_v23 = vand.u32 4294901760, %v2724_v17  ;;  %v2766_v29 = vsub.f32 %v324_v8, %v2706_v11  ;;  %v310_v47 = vld [vmem:[%s288_s8] sm:$0xff]  ;;  %v311_v50 = vld [vmem:[%s288_s8 + $0x8] sm:$0xff] }
  0x11   : > { %2189 = vmatpush3.msra.mxu0 %v2689_v4  ;;  %v2755_v25 = vand.u32 4294901760, %v2735_v19  ;;  %v2760_v27 = vand.u32 4294901760, %v2738_v20  ;;  %v2776_v33 = vsub.f32 %v323_v12, %v2721_v16  ;;  %v2793_v39 = vand.u32 4294901760, %v320_v28 }
  0x12   : > { %2190 = vmatprep.subr.mxu0 %v2691_v5  ;;  %v442_v30 = vsub.f32 %v2716_v14, %v2742_v21  ;;  %v449_v31 = vsub.f32 %v2719_v15, %v2745_v22  ;;  %v456_v32 = vsub.f32 %v2724_v17, %v2748_v23  ;;  %v2780_v34 = vand.u32 4294901760, %v2766_v29 }
  0x13   : > { %2191 = vmatpush3.msra.mxu0 %v2691_v5  ;;  %v463_v38 = vsub.f32 %v2735_v19, %v2755_v25  ;;  %v470_v40 = vsub.f32 %v2738_v20, %v2760_v27  ;;  %v2799_v41 = vand.u32 4294901760, %v2776_v33  ;;  %v2805_v43 = vsub.f32 %v322_v13, %v2750_v24 }
  0x14   : > { %2192 = vmatprep.subr.mxu0 %v2702_v9  ;;  %v443_v36 = vand.u32 4294901760, %v442_v30  ;;  %v450_v37 = vand.u32 4294901760, %v449_v31  ;;  %v457_v44 = vand.u32 4294901760, %v456_v32  ;;  %v2808_v45 = vand.u32 4294901760, %v319_v35  ;;  %v314_v30 = vld [vmem:[%s3662_s2] sm:$0xff] }
  0x15   : > { %2193 = vmatpush3.msra.mxu0 %v2702_v9  ;;  %v2811_v46 = vsub.f32 %v321_v18, %v2757_v26  ;;  %v477_v48 = vsub.f32 %v2766_v29, %v2780_v34  ;;  %v464_v51 = vand.u32 4294901760, %v463_v38  ;;  %v2820_v52 = vand.u32 4294901760, %v318_v42 }
  0x16   : > { %2194 = vmatprep.subr.mxu0 %v2704_v10  ;;  %2221 = vmatprep.subr.mxu1 %v443_v36  ;;  %v2823_v53 = vand.u32 4294901760, %v2805_v43  ;;  %v2826_v54 = vsub.f32 %v320_v28, %v2793_v39  ;;  %v471_v55 = vand.u32 4294901760, %v470_v40  ;;  %v484_v56 = vsub.f32 %v2776_v33, %v2799_v41 }
  0x17   : > { %2195 = vmatpush3.msra.mxu0 %v2704_v10  ;;  %2222 = vmatpush3.msra.mxu1 %v443_v36  ;;  %v312_v57 = vmax.f32 %v310_v47, 0.0  ;;  %v2832_v58 = vand.u32 4294901760, %v317_v49  ;;  %v2835_v59 = vand.u32 4294901760, %v2811_v46  ;;  %v2841_v61 = vsub.f32 %v319_v35, %v2808_v45 }
  0x18   : > { %2196 = vmatprep.subr.mxu0 %v2706_v11  ;;  %2223 = vmatprep.subr.mxu1 %v450_v37  ;;  %v313_v62 = vmax.f32 %v311_v50, 0.0  ;;  %v478_v63 = vand.u32 4294901760, %v477_v48  ;;  %v491_v1 = vsub.f32 %v2805_v43, %v2823_v53  ;;  %v2850_v2 = vand.u32 4294901760, %v2826_v54 }
  0x19   : > { %2197 = vmatpush3.msra.mxu0 %v2706_v11  ;;  %2224 = vmatpush3.msra.mxu1 %v450_v37  ;;  %v2844_v0 = vand.u32 4294901760, %v312_v57  ;;  %v2856_v7 = vsub.f32 %v318_v42, %v2820_v52  ;;  %v485_v12 = vand.u32 4294901760, %v484_v56  ;;  %v2861_v13 = vand.u32 4294901760, %v316_v60 }
  0x1a   : > { %2198 = vmatprep.subr.mxu0 %v2721_v16  ;;  %2225 = vmatprep.subr.mxu1 %v457_v44  ;;  %v2858_v8 = vand.u32 4294901760, %v313_v62  ;;  %v498_v18 = vsub.f32 %v2811_v46, %v2835_v59  ;;  %v2867_v28 = vand.u32 4294901760, %v2841_v61  ;;  %v2876_v32 = vsub.f32 %v317_v49, %v2832_v58 }
  0x1b   : > { %2199 = vmatpush3.msra.mxu0 %v2721_v16  ;;  %2226 = vmatpush3.msra.mxu1 %v457_v44  ;;  %v2873_v31 = vsub.f32 %v312_v57, %v2844_v0  ;;  %v2879_v35 = vand.u32 4294901760, %v315_v6  ;;  %v492_v37 = vand.u32 4294901760, %v491_v1  ;;  %v505_v38 = vsub.f32 %v2826_v54, %v2850_v2 }
  0x1c   : > { %2200 = vmatprep.subr.mxu0 %v2750_v24  ;;  %2227 = vmatprep.subr.mxu1 %v464_v51  ;;  %v2882_v36 = vsub.f32 %v313_v62, %v2858_v8  ;;  %v2888_v40 = vand.u32 4294901760, %v2856_v7  ;;  %v2891_v42 = vand.u32 4294901760, %v314_v30  ;;  %v2894_v44 = vsub.f32 %v316_v60, %v2861_v13 }
  0x1d   : > { %2201 = vmatpush3.msra.mxu0 %v2750_v24  ;;  %2228 = vmatpush3.msra.mxu1 %v464_v51  ;;  %v499_v47 = vand.u32 4294901760, %v498_v18  ;;  %v512_v48 = vsub.f32 %v2841_v61, %v2867_v28  ;;  %v3669_v49 = vand.u32 4294901760, %v2873_v31  ;;  %v2901_v50 = vand.u32 4294901760, %v2876_v32 }
  0x1e   : > { %2202 = vmatprep.subr.mxu0 %v2757_v26  ;;  %2229 = vmatprep.subr.mxu1 %v471_v55  ;;  %v3668_v51 = vand.u32 4294901760, %v2882_v36  ;;  %v506_v56 = vand.u32 4294901760, %v505_v38  ;;  %v519_v57 = vsub.f32 %v2856_v7, %v2888_v40  ;;  %v2913_v60 = vand.u32 4294901760, %v2894_v44 }
  0x1f   : > { %2203 = vmatpush3.msra.mxu0 %v2757_v26  ;;  %2230 = vmatpush3.msra.mxu1 %v471_v55  ;;  %v2906_v55 = vsub.f32 %v315_v6, %v2879_v35  ;;  %v2916_v62 = vsub.f32 %v314_v30, %v2891_v42  ;;  %v421_v1 = vsub.f32 %v2873_v31, %v3669_v49 }
  0x20   : > { %2204 = vmatprep.subr.mxu0 %v2793_v39  ;;  %2231 = vmatprep.subr.mxu1 %v478_v63  ;;  %v526_v6 = vsub.f32 %v2876_v32, %v2901_v50  ;;  %v520_v30 = vand.u32 4294901760, %v519_v57 }
  0x21   : > { %2205 = vmatpush3.msra.mxu0 %v2793_v39  ;;  %2232 = vmatpush3.msra.mxu1 %v478_v63  ;;  %v513_v63 = vand.u32 4294901760, %v512_v48  ;;  %v2929_v18 = vand.u32 4294901760, %v2906_v55  ;;  %v2936_v38 = vand.u32 4294901760, %v2916_v62 }
  0x22   : > { %2206 = vmatprep.subr.mxu0 %v2808_v45  ;;  %2233 = vmatprep.subr.mxu1 %v485_v12  ;;  %v527_v48 = vand.u32 4294901760, %v526_v6 }
  0x23   : > { %2207 = vmatpush3.msra.mxu0 %v2808_v45  ;;  %2234 = vmatpush3.msra.mxu1 %v485_v12  ;;  %v431_v12 = vsub.f32 %v2882_v36, %v3668_v51  ;;  %v540_v57 = vsub.f32 %v2906_v55, %v2929_v18  ;;  %v547_v49 = vsub.f32 %v2916_v62, %v2936_v38 }
  0x24   : > { %2208 = vmatprep.subr.mxu0 %v2820_v52  ;;  %2235 = vmatprep.subr.mxu1 %v492_v37 }
  0x25   : > { %2209 = vmatpush3.msra.mxu0 %v2820_v52  ;;  %2236 = vmatpush3.msra.mxu1 %v492_v37  ;;  %v533_v37 = vsub.f32 %v2894_v44, %v2913_v60  ;;  %v432_v51 = vand.u32 4294901760, %v431_v12 }
  0x26   : > { %2210 = vmatprep.subr.mxu0 %v2832_v58  ;;  %2237 = vmatprep.subr.mxu1 %v499_v47 }
  0x27   : > { %2211 = vmatpush3.msra.mxu0 %v2832_v58  ;;  %2238 = vmatpush3.msra.mxu1 %v499_v47  ;;  %v422_v47 = vand.u32 4294901760, %v421_v1  ;;  %v548_v1 = vand.u32 4294901760, %v547_v49 }
  0x28   : > { %2212 = vmatprep.subr.mxu0 %v2861_v13  ;;  %2239 = vmatprep.subr.mxu1 %v506_v56 }
  0x29   : > { %2213 = vmatpush3.msra.mxu0 %v2861_v13  ;;  %2240 = vmatpush3.msra.mxu1 %v506_v56  ;;  %v534_v56 = vand.u32 4294901760, %v533_v37 }
  0x2a   : > { %2214 = vmatprep.subr.mxu0 %v2879_v35  ;;  %2241 = vmatprep.subr.mxu1 %v513_v63 }
  0x2b   : > { %2215 = vmatpush3.msra.mxu0 %v2879_v35  ;;  %2242 = vmatpush3.msra.mxu1 %v513_v63  ;;  %v541_v63 = vand.u32 4294901760, %v540_v57 }
  0x2c   : > { %2216 = vmatprep.subr.mxu0 %v2891_v42  ;;  %2243 = vmatprep.subr.mxu1 %v520_v30 }
  0x2d   : > { %2217 = vmatpush3.msra.mxu0 %v2891_v42  ;;  %2244 = vmatpush3.msra.mxu1 %v520_v30 }
  0x2e   : > { %2218 = vmatprep.mubr.f32.mxu0 %v422_v47  ;;  %2245 = vmatprep.subr.mxu1 %v527_v48 }
  0x2f   : > { %2256 = vmatprep.subr.mxu0 %v2716_v14  ;;  %2219 = vmatmul.mubr.f32.vlgmr.msra.gmra.mxu0 %v432_v51 }
  0x30   : > { %2246 = vmatpush3.msra.mxu1 %v527_v48  ;;  %2257 = vmatpush3.msra.mxu0 %v2716_v14  ;;  %v3673_v14 = vand.u32 4294901760, %v2873_v31 }
  0x31   : > { %2247 = vmatprep.subr.mxu1 %v534_v56  ;;  %2258 = vmatprep.subr.mxu0 %v2719_v15 }
  0x32   : > { %2248 = vmatpush3.msra.mxu1 %v534_v56  ;;  %2259 = vmatpush3.msra.mxu0 %v2719_v15  ;;  %v3674_v15 = vand.u32 4294901760, %v2882_v36 }
  0x33   : > { %2249 = vmatprep.subr.mxu1 %v541_v63  ;;  %2260 = vmatprep.subr.mxu0 %v2724_v17 }
  0x34   : > { %2250 = vmatpush3.msra.mxu1 %v541_v63  ;;  %2261 = vmatpush3.msra.mxu0 %v2724_v17  ;;  %v1036_v17 = vld [vmem:[%s3664_s4 + $0x58] sm:$0xff] }
  0x35   : > { %2251 = vmatprep.subr.mxu1 %v548_v1  ;;  %2262 = vmatprep.subr.mxu0 %v2735_v19 }
  0x36   : > { %2252 = vmatpush3.msra.mxu1 %v548_v1  ;;  %2253 = vmatprep.mubr.f32.mxu1 %v2844_v0  ;;  %v1027_v1 = vld [vmem:[%s3664_s4 + $0x10] sm:$0xff] }
  0x37   : > { %2263 = vmatpush3.msra.mxu0 %v2735_v19  ;;  %2254 = vmatmul.mubr.f32.vlgmr.msra.gmra.mxu1 %v2858_v8 }
  0x38   : > { %2264 = vmatprep.subr.mxu0 %v2738_v20  ;;  %2291 = vmatprep.subr.mxu1 %v2687_v3 }
  0x39   : > { %2265 = vmatpush3.msra.mxu0 %v2738_v20  ;;  %2292 = vmatpush3.msra.mxu1 %v2687_v3 }
  0x3a   : > { %2266 = vmatprep.subr.mxu0 %v2766_v29  ;;  %2293 = vmatprep.subr.mxu1 %v2689_v4 }
  0x3b   : > { %2267 = vmatpush3.msra.mxu0 %v2766_v29  ;;  %2294 = vmatpush3.msra.mxu1 %v2689_v4 }
  0x3c   : > { %2268 = vmatprep.subr.mxu0 %v2776_v33  ;;  %2295 = vmatprep.subr.mxu1 %v2691_v5 }
  0x3d   : > { %2269 = vmatpush3.msra.mxu0 %v2776_v33  ;;  %2296 = vmatpush3.msra.mxu1 %v2691_v5 }
  0x3e   : > { %2270 = vmatprep.subr.mxu0 %v2805_v43  ;;  %2297 = vmatprep.subr.mxu1 %v2702_v9 }
  0x3f   : > { %2271 = vmatpush3.msra.mxu0 %v2805_v43  ;;  %2298 = vmatpush3.msra.mxu1 %v2702_v9 }
  0x40   : > { %2272 = vmatprep.subr.mxu0 %v2811_v46  ;;  %2299 = vmatprep.subr.mxu1 %v2704_v10 }
  0x41   : > { %2273 = vmatpush3.msra.mxu0 %v2811_v46  ;;  %2300 = vmatpush3.msra.mxu1 %v2704_v10  ;;  %v1032_v46 = vld [vmem:[%s3664_s4 + $0x38] sm:$0xff] }
  0x42   : > { %2274 = vmatprep.subr.mxu0 %v2826_v54  ;;  %2301 = vmatprep.subr.mxu1 %v2706_v11 }
  0x43   : > { %2275 = vmatpush3.msra.mxu0 %v2826_v54  ;;  %2302 = vmatpush3.msra.mxu1 %v2706_v11 }
  0x44   : > { %2276 = vmatprep.subr.mxu0 %v2841_v61  ;;  %2303 = vmatprep.subr.mxu1 %v2721_v16 }
  0x45   : > { %2277 = vmatpush3.msra.mxu0 %v2841_v61  ;;  %2304 = vmatpush3.msra.mxu1 %v2721_v16 }
  0x46   : > { %2278 = vmatprep.subr.mxu0 %v2856_v7  ;;  %2305 = vmatprep.subr.mxu1 %v2750_v24 }
  0x47   : > { %2279 = vmatpush3.msra.mxu0 %v2856_v7  ;;  %2306 = vmatpush3.msra.mxu1 %v2750_v24 }
  0x48   : > { %2280 = vmatprep.subr.mxu0 %v2876_v32  ;;  %2307 = vmatprep.subr.mxu1 %v2757_v26 }
  0x49   : > { %2281 = vmatpush3.msra.mxu0 %v2876_v32  ;;  %2308 = vmatpush3.msra.mxu1 %v2757_v26  ;;  %v1030_v32 = vld [vmem:[%s3664_s4 + $0x28] sm:$0xff] }
  0x4a   : > { %2282 = vmatprep.subr.mxu0 %v2894_v44  ;;  %2309 = vmatprep.subr.mxu1 %v2793_v39 }
  0x4b   : > { %2283 = vmatpush3.msra.mxu0 %v2894_v44  ;;  %2310 = vmatpush3.msra.mxu1 %v2793_v39 }
  0x4c   : > { %2284 = vmatprep.subr.mxu0 %v2906_v55  ;;  %2311 = vmatprep.subr.mxu1 %v2808_v45 }
  0x4d   : > { %2285 = vmatpush3.msra.mxu0 %v2906_v55  ;;  %2312 = vmatpush3.msra.mxu1 %v2808_v45 }
  0x4e   : > { %2286 = vmatprep.subr.mxu0 %v2916_v62  ;;  %2313 = vmatprep.subr.mxu1 %v2820_v52 }
  0x4f   : > { %2287 = vmatpush3.msra.mxu0 %v2916_v62  ;;  %2288 = vmatprep.mubr.f32.mxu0 %v2873_v31 }
  0x50   : > { %2314 = vmatpush3.msra.mxu1 %v2820_v52  ;;  %2289 = vmatmul.mubr.f32.vlgmr.msra.gmra.mxu0 %v2882_v36  ;;  %v1021_v36 = vld [vmem:[%s293_s19] sm:$0xff] }
  0x51   : > { %2315 = vmatprep.subr.mxu1 %v2832_v58  ;;  %2326 = vmatprep.subr.mxu0 %v2742_v21  ;;  %v1023_v6 = vmax.f32 %v1021_v36, 0.0 }
  0x52   : > { %2316 = vmatpush3.msra.mxu1 %v2832_v58  ;;  %2327 = vmatpush3.msra.mxu0 %v2742_v21 }
  0x53   : > { %2317 = vmatprep.subr.mxu1 %v2861_v13  ;;  %2328 = vmatprep.subr.mxu0 %v2745_v22 }
  0x54   : > { %2318 = vmatpush3.msra.mxu1 %v2861_v13  ;;  %2329 = vmatpush3.msra.mxu0 %v2745_v22  ;;  %v3099_v22 = vand.u32 4294901760, %v1036_v17 }
  0x55   : > { %2319 = vmatprep.subr.mxu1 %v2879_v35  ;;  %2330 = vmatprep.subr.mxu0 %v2748_v23 }
  0x56   : > { %2320 = vmatpush3.msra.mxu1 %v2879_v35  ;;  %2331 = vmatpush3.msra.mxu0 %v2748_v23  ;;  %v1035_v23 = vld [vmem:[%s3664_s4 + $0x50] sm:$0xff] }
  0x57   : > { %2321 = vmatprep.subr.mxu1 %v2891_v42  ;;  %2332 = vmatprep.subr.mxu0 %v2755_v25 }
  0x58   : > { %2322 = vmatpush3.msra.mxu1 %v2891_v42  ;;  %2323 = vmatprep.mubr.f32.mxu1 %v3673_v14 }
  0x59   : > { %2333 = vmatpush3.msra.mxu0 %v2755_v25  ;;  %2324 = vmatmul.mubr.f32.vlgmr.msra.gmra.mxu1 %v3674_v15  ;;  %v1034_v25 = vld [vmem:[%s3664_s4 + $0x48] sm:$0xff]  ;;  %v3249_v15 = vand.u32 4294901760, %v1023_v6 }
  0x5a   : > { %2334 = vmatprep.subr.mxu0 %v2760_v27  ;;  %2361 = vmatprep.subr.mxu1 %v2687_v3 }
  0x5b   : > { %2335 = vmatpush3.msra.mxu0 %v2760_v27  ;;  %2362 = vmatpush3.msra.mxu1 %v2687_v3  ;;  %v1040_v3 = vld [vmem:[%s3664_s4 + $0x78] sm:$0xff]  ;;  %v3119_v27 = vand.u32 4294901760, %v1035_v23 }
  0x5c   : > { %2336 = vmatprep.subr.mxu0 %v2780_v34  ;;  %2363 = vmatprep.subr.mxu1 %v2689_v4 }
  0x5d   : > { %2337 = vmatpush3.msra.mxu0 %v2780_v34  ;;  %2364 = vmatpush3.msra.mxu1 %v2689_v4  ;;  %v1039_v4 = vld [vmem:[%s3664_s4 + $0x70] sm:$0xff]  ;;  %v3129_v34 = vand.u32 4294901760, %v1034_v25 }
  0x5e   : > { %2338 = vmatprep.subr.mxu0 %v2799_v41  ;;  %2365 = vmatprep.subr.mxu1 %v2691_v5 }
  0x5f   : > { %2339 = vmatpush3.msra.mxu0 %v2799_v41  ;;  %2366 = vmatpush3.msra.mxu1 %v2691_v5  ;;  %v3062_v5 = vand.u32 4294901760, %v1040_v3  ;;  %v3135_v41 = vsub.f32 %v1036_v17, %v3099_v22  ;;  %v1026_v17 = vld [vmem:[%s3664_s4 + $0x8] sm:$0xff] }
  0x60   : > { %2340 = vmatprep.subr.mxu0 %v2823_v53  ;;  %2367 = vmatprep.subr.mxu1 %v2702_v9 }
  0x61   : > { %2341 = vmatpush3.msra.mxu0 %v2823_v53  ;;  %2368 = vmatpush3.msra.mxu1 %v2702_v9  ;;  %v1038_v9 = vld [vmem:[%s3664_s4 + $0x68] sm:$0xff]  ;;  %v3086_v19 = vsub.f32 %v1040_v3, %v3062_v5  ;;  %v3172_v61 = vand.u32 4294901760, %v3135_v41 }
  0x62   : > { %2342 = vmatprep.subr.mxu0 %v2835_v59  ;;  %2369 = vmatprep.subr.mxu1 %v2704_v10 }
  0x63   : > { %2343 = vmatpush3.msra.mxu0 %v2835_v59  ;;  %2370 = vmatpush3.msra.mxu1 %v2704_v10  ;;  %v3071_v10 = vand.u32 4294901760, %v1039_v4  ;;  %v3167_v59 = vsub.f32 %v1035_v23, %v3119_v27 }
  0x64   : > { %2344 = vmatprep.subr.mxu0 %v2850_v2  ;;  %2371 = vmatprep.subr.mxu1 %v2706_v11 }
  0x65   : > { %2345 = vmatpush3.msra.mxu0 %v2850_v2  ;;  %2372 = vmatpush3.msra.mxu1 %v2706_v11  ;;  %v1037_v11 = vld [vmem:[%s3664_s4 + $0x60] sm:$0xff]  ;;  %v3095_v21 = vsub.f32 %v1039_v4, %v3071_v10  ;;  %v3175_v2 = vsub.f32 %v1034_v25, %v3129_v34  ;;  %v3197_v49 = vand.u32 4294901760, %v3167_v59 }
  0x66   : > { %2346 = vmatprep.subr.mxu0 %v2867_v28  ;;  %2373 = vmatprep.subr.mxu1 %v2721_v16  ;;  %v3092_v20 = vand.u32 4294901760, %v1037_v11 }
  0x67   : > { %2347 = vmatpush3.msra.mxu0 %v2867_v28  ;;  %2374 = vmatpush3.msra.mxu1 %v2721_v16  ;;  %v3080_v16 = vand.u32 4294901760, %v1038_v9  ;;  %v3122_v29 = vand.u32 4294901760, %v3095_v21  ;;  %v3181_v28 = vand.u32 4294901760, %v1032_v46  ;;  %v1188_v37 = vsub.f32 %v3167_v59, %v3197_v49 }
  0x68   : > { %2348 = vmatprep.subr.mxu0 %v2888_v40  ;;  %2375 = vmatprep.subr.mxu1 %v2750_v24  ;;  %v3125_v33 = vsub.f32 %v1037_v11, %v3092_v20 }
  0x69   : > { %2349 = vmatpush3.msra.mxu0 %v2888_v40  ;;  %2376 = vmatpush3.msra.mxu1 %v2750_v24  ;;  %v3107_v24 = vand.u32 4294901760, %v3086_v19  ;;  %v3216_v62 = vsub.f32 %v1032_v46, %v3181_v28  ;;  %v1189_v4 = vand.u32 4294901760, %v1188_v37 }
  0x6a   : > { %2350 = vmatprep.subr.mxu0 %v2901_v50  ;;  %2377 = vmatprep.subr.mxu1 %v2757_v26  ;;  %v3161_v54 = vand.u32 4294901760, %v3125_v33 }
  0x6b   : > { %2351 = vmatpush3.msra.mxu0 %v2901_v50  ;;  %2378 = vmatpush3.msra.mxu1 %v2757_v26  ;;  %v3113_v26 = vsub.f32 %v1038_v9, %v3080_v16  ;;  %v1153_v43 = vsub.f32 %v3086_v19, %v3107_v24  ;;  %v1029_v50 = vld [vmem:[%s3664_s4 + $0x20] sm:$0xff]  ;;  %v3241_v63 = vand.u32 4294901760, %v3216_v62 }
  0x6c   : > { %2352 = vmatprep.subr.mxu0 %v2913_v60  ;;  %2379 = vmatprep.subr.mxu1 %v2793_v39  ;;  %v1174_v44 = vsub.f32 %v3125_v33, %v3161_v54 }
  0x6d   : > { %2353 = vmatpush3.msra.mxu0 %v2913_v60  ;;  %2380 = vmatpush3.msra.mxu1 %v2793_v39  ;;  %v1033_v39 = vld [vmem:[%s3664_s4 + $0x40] sm:$0xff]  ;;  %v1154_v7 = vand.u32 4294901760, %v1153_v43  ;;  %v3213_v60 = vand.u32 4294901760, %v1030_v32  ;;  %v1209_v43 = vsub.f32 %v3216_v62, %v3241_v63 }
  0x6e   : > { %2354 = vmatprep.subr.mxu0 %v2929_v18  ;;  %2381 = vmatprep.subr.mxu1 %v2808_v45  ;;  %v3158_v53 = vand.u32 4294901760, %v1033_v39  ;;  %v1175_v30 = vand.u32 4294901760, %v1174_v44 }
  0x6f   : > { %2355 = vmatpush3.msra.mxu0 %v2929_v18  ;;  %2382 = vmatpush3.msra.mxu1 %v2808_v45  ;;  %v3142_v45 = vand.u32 4294901760, %v3113_v26  ;;  %v1028_v18 = vld [vmem:[%s3664_s4 + $0x18] sm:$0xff]  ;;  %v3247_v14 = vsub.f32 %v1030_v32, %v3213_v60 }
  0x70   : > { %2356 = vmatprep.subr.mxu0 %v2936_v38  ;;  %2383 = vmatprep.subr.mxu1 %v2820_v52  ;;  %v3203_v51 = vsub.f32 %v1033_v39, %v3158_v53  ;;  %v3238_v56 = vand.u32 4294901760, %v1028_v18  ;;  %v3267_v39 = vand.u32 4294901760, %v1027_v1 }
  0x71   : > { %2357 = vmatpush3.msra.mxu0 %v2936_v38  ;;  %2358 = vmatprep.mubr.f32.mxu0 %v2844_v0  ;;  %v3273_v46 = vand.u32 4294901760, %v3247_v14 }
  0x72   : > { %2384 = vmatpush3.msra.mxu1 %v2820_v52  ;;  %2359 = vmatmul.mubr.f32.vlgmr.msra.gmra.mxu0 %v2858_v8  ;;  %v1160_v52 = vsub.f32 %v3095_v21, %v3122_v29  ;;  %v3229_v38 = vand.u32 4294901760, %v3203_v51 }
  0x73   : > { %2385 = vmatprep.subr.mxu1 %v2832_v58  ;;  %2396 = vmatprep.subr.mxu0 %v3062_v5 }
  0x74   : > { %2386 = vmatpush3.msra.mxu1 %v2832_v58  ;;  %2397 = vmatpush3.msra.mxu0 %v3062_v5  ;;  %v1031_v58 = vld [vmem:[%s3664_s4 + $0x30] sm:$0xff]  ;;  %v1161_v40 = vand.u32 4294901760, %v1160_v52  ;;  %v1202_v9 = vsub.f32 %v3203_v51, %v3229_v38  ;;  %v1025_v52 = vld [vmem:[%s3664_s4] sm:$0xff] }
  0x75   : > { %2387 = vmatprep.subr.mxu1 %v2861_v13  ;;  %2398 = vmatprep.subr.mxu0 %v3071_v10  ;;  %v3185_v31 = vand.u32 4294901760, %v1031_v58  ;;  %v3297_v44 = vand.u32 4294901760, %v1025_v52 }
  0x76   : > { %2388 = vmatpush3.msra.mxu1 %v2861_v13  ;;  %2399 = vmatpush3.msra.mxu0 %v3071_v10  ;;  %v1167_v13 = vsub.f32 %v3113_v26, %v3142_v45  ;;  %v1203_v36 = vand.u32 4294901760, %v1202_v9 }
  0x77   : > { %2389 = vmatprep.subr.mxu1 %v2879_v35  ;;  %2400 = vmatprep.subr.mxu0 %v3080_v16  ;;  %v3232_v47 = vsub.f32 %v1031_v58, %v3185_v31  ;;  %v3279_v58 = vsub.f32 %v1023_v6, %v3249_v15 }
  0x78   : > { %2390 = vmatpush3.msra.mxu1 %v2879_v35  ;;  %2401 = vmatpush3.msra.mxu0 %v3080_v16  ;;  %v3190_v35 = vld [vmem:[%s293_s19 + $0x8] sm:$0xff]  ;;  %v1168_v55 = vand.u32 4294901760, %v1167_v13  ;;  %v3285_v13 = vand.u32 4294901760, %v1026_v17  ;;  %s1969_s19 = sshll.u32 %s3678_s25, 6 }
  0x79   : > { %2391 = vmatprep.subr.mxu1 %v2891_v42  ;;  %2402 = vmatprep.subr.mxu0 %v3092_v20  ;;  %v1024_v12 = vmax.f32 %v3190_v35, 0.0  ;;  %v3258_v11 = vand.u32 4294901760, %v3232_v47  ;;  %v3671_v6 = vand.u32 4294901760, %v3279_v58  ;;  %s3600_s27 = scalar_lea.vmem %s3667_s7, %s1969_s19 }
  0x7a   : > { %2392 = vmatpush3.msra.mxu1 %v2891_v42  ;;  %2393 = vmatprep.mubr.f32.mxu1 %v2844_v0  ;;  %v1181_v0 = vsub.f32 %v3135_v41, %v3172_v61  ;;  %v3210_v42 = vand.u32 4294901760, %v3175_v2 }
  0x7b   : > { %2403 = vmatpush3.msra.mxu0 %v3092_v20  ;;  %2394 = vmatmul.mubr.f32.vlgmr.msra.gmra.mxu1 %v2858_v8  ;;  %v3220_v8 = vand.u32 4294901760, %v1029_v50  ;;  %v3251_v3 = vand.u32 4294901760, %v1024_v12  ;;  %v1216_v35 = vsub.f32 %v3232_v47, %v3258_v11  ;;  %v1132_v9 = vsub.f32 %v3279_v58, %v3671_v6 }
  0x7c   : > { %2404 = vmatprep.subr.mxu0 %v3099_v22  ;;  %2431 = vmatprep.subr.mxu1 %v1154_v7  ;;  %v1182_v48 = vand.u32 4294901760, %v1181_v0  ;;  %v1195_v57 = vsub.f32 %v3175_v2, %v3210_v42  ;;  %v1210_v0 = vand.u32 4294901760, %v1209_v43 }
  0x7d   : > { %2405 = vmatpush3.msra.mxu0 %v3099_v22  ;;  %2432 = vmatpush3.msra.mxu1 %v1154_v7  ;;  %v3264_v23 = vsub.f32 %v1029_v50, %v3220_v8  ;;  %v3282_v7 = vsub.f32 %v1028_v18, %v3238_v56  ;;  %v3288_v32 = vsub.f32 %v1024_v12, %v3251_v3  ;;  %v1217_v37 = vand.u32 4294901760, %v1216_v35 }
  0x7e   : > { %2406 = vmatprep.subr.mxu0 %v3119_v27  ;;  %2433 = vmatprep.subr.mxu1 %v1161_v40  ;;  %v1196_v25 = vand.u32 4294901760, %v1195_v57  ;;  %v3300_v50 = vsub.f32 %v1027_v1, %v3267_v39  ;;  %v3322_v1 = vsub.f32 %v1025_v52, %v3297_v44 }
  0x7f   : > { %2407 = vmatpush3.msra.mxu0 %v3119_v27  ;;  %2434 = vmatpush3.msra.mxu1 %v1161_v40  ;;  %v3294_v40 = vand.u32 4294901760, %v3264_v23  ;;  %v3307_v12 = vand.u32 4294901760, %v3282_v7  ;;  %v3670_v18 = vand.u32 4294901760, %v3288_v32 }
  0x80   : > { %2408 = vmatprep.subr.mxu0 %v3129_v34  ;;  %2435 = vmatprep.subr.mxu1 %v1168_v55  ;;  %v3319_v57 = vand.u32 4294901760, %v3300_v50  ;;  %v3342_v35 = vand.u32 4294901760, %v3322_v1 }
  0x81   : > { %2409 = vmatpush3.msra.mxu0 %v3129_v34  ;;  %2436 = vmatpush3.msra.mxu1 %v1168_v55  ;;  %v1223_v55 = vsub.f32 %v3247_v14, %v3273_v46 }
  0x82   : > { %2410 = vmatprep.subr.mxu0 %v3158_v53  ;;  %2437 = vmatprep.subr.mxu1 %v1175_v30  ;;  %v1258_v6 = vsub.f32 %v3322_v1, %v3342_v35 }
  0x83   : > { %2411 = vmatpush3.msra.mxu0 %v3158_v53  ;;  %2438 = vmatpush3.msra.mxu1 %v1175_v30  ;;  %v3312_v30 = vsub.f32 %v1026_v17, %v3285_v13  ;;  %v1237_v17 = vsub.f32 %v3282_v7, %v3307_v12 }
  0x84   : > { %2412 = vmatprep.subr.mxu0 %v3181_v28  ;;  %2439 = vmatprep.subr.mxu1 %v1182_v48 }
  0x85   : > { %2413 = vmatpush3.msra.mxu0 %v3181_v28  ;;  %2440 = vmatpush3.msra.mxu1 %v1182_v48  ;;  %v1230_v48 = vsub.f32 %v3264_v23, %v3294_v40  ;;  %v3335_v43 = vand.u32 4294901760, %v3312_v30 }
  0x86   : > { %2414 = vmatprep.subr.mxu0 %v3185_v31  ;;  %2441 = vmatprep.subr.mxu1 %v1189_v4 }
  0x87   : > { %2415 = vmatpush3.msra.mxu0 %v3185_v31  ;;  %2442 = vmatpush3.msra.mxu1 %v1189_v4  ;;  %v1224_v4 = vand.u32 4294901760, %v1223_v55  ;;  %v1231_v52 = vand.u32 4294901760, %v1230_v48  ;;  %v1238_v55 = vand.u32 4294901760, %v1237_v17  ;;  %v1251_v48 = vsub.f32 %v3312_v30, %v3335_v43 }
  0x88   : > { %2416 = vmatprep.subr.mxu0 %v3213_v60  ;;  %2443 = vmatprep.subr.mxu1 %v1196_v25  ;;  %v299_v17 = vlaneseq }
  0x89   : > { %2417 = vmatpush3.msra.mxu0 %v3213_v60  ;;  %2444 = vmatpush3.msra.mxu1 %v1196_v25  ;;  %v1142_v25 = vsub.f32 %v3288_v32, %v3670_v18 }
  0x8a   : > { %2418 = vmatprep.subr.mxu0 %v3220_v8  ;;  %2445 = vmatprep.subr.mxu1 %v1203_v36 }
  0x8b   : > { %2419 = vmatpush3.msra.mxu0 %v3220_v8  ;;  %2446 = vmatpush3.msra.mxu1 %v1203_v36  ;;  %v1244_v36 = vsub.f32 %v3300_v50, %v3319_v57  ;;  %v1143_v18 = vand.u32 4294901760, %v1142_v25  ;;  %v3522_v25 = vand.u32 127, %v299_v17 }
  0x8c   : > { %2420 = vmatprep.subr.mxu0 %v3238_v56  ;;  %2447 = vmatprep.subr.mxu1 %v1210_v0 }
  0x8d   : > { %2421 = vmatpush3.msra.mxu0 %v3238_v56  ;;  %2448 = vmatpush3.msra.mxu1 %v1210_v0  ;;  %v1133_v0 = vand.u32 4294901760, %v1132_v9  ;;  %v1259_v9 = vand.u32 4294901760, %v1258_v6  ;;  %vm305_vm0 = vcmp.lt.s32.totalorder %v3522_v25, 8  ;;  %vm304_vm1 = vcmp.ge.s32.totalorder %v3522_v25, 120 }
  0x8e   : > { %2422 = vmatprep.subr.mxu0 %v3267_v39  ;;  %2449 = vmatprep.subr.mxu1 %v1217_v37 }
  0x8f   : > { %2423 = vmatpush3.msra.mxu0 %v3267_v39  ;;  %2450 = vmatpush3.msra.mxu1 %v1217_v37  ;;  %v1245_v37 = vand.u32 4294901760, %v1244_v36 }
  0x90   : > { %2424 = vmatprep.subr.mxu0 %v3285_v13  ;;  %2451 = vmatprep.subr.mxu1 %v1224_v4 }
  0x91   : > { %2425 = vmatpush3.msra.mxu0 %v3285_v13  ;;  %2452 = vmatpush3.msra.mxu1 %v1224_v4  ;;  %v1252_v4 = vand.u32 4294901760, %v1251_v48  ;;  %v3533_v48 = vshrl.u32 %v299_v17, 7 }
  0x92   : > { %2426 = vmatprep.subr.mxu0 %v3297_v44  ;;  %2453 = vmatprep.subr.mxu1 %v1231_v52 }
  0x93   : > { %2427 = vmatpush3.msra.mxu0 %v3297_v44  ;;  %2454 = vmatpush3.msra.mxu1 %v1231_v52  ;;  %vm308_vm2 = vcmp.eq.s32.totalorder %v3533_v48, 0  ;;  %vm1750_vm3 = vcmp.lt.s32.totalorder %v3533_v48, 7  ;;  %vm1759_vm5 = vcmp.lt.s32.totalorder %v3533_v48, 1 }
  0x94   : > { %2428 = vmatprep.mubr.f32.mxu0 %v1133_v0  ;;  %2455 = vmatprep.subr.mxu1 %v1238_v55 }
  0x95   : > { %2466 = vmatprep.subr.mxu0 %v3086_v19  ;;  %2429 = vmatmul.mubr.f32.vlgmr.msra.gmra.mxu0 %v1143_v18 }
  0x96   : > { %2456 = vmatpush3.msra.mxu1 %v1238_v55  ;;  %2467 = vmatpush3.msra.mxu0 %v3086_v19  ;;  %v3675_v19 = vand.u32 4294901760, %v3279_v58 }
  0x97   : > { %2457 = vmatprep.subr.mxu1 %v1245_v37  ;;  %2468 = vmatprep.subr.mxu0 %v3095_v21 }
  0x98   : > { %2458 = vmatpush3.msra.mxu1 %v1245_v37  ;;  %2469 = vmatpush3.msra.mxu0 %v3095_v21  ;;  %v3676_v21 = vand.u32 4294901760, %v3288_v32 }
  0x99   : > { %2459 = vmatprep.subr.mxu1 %v1252_v4  ;;  %2470 = vmatprep.subr.mxu0 %v3113_v26 }
  0x9a   : > { %2460 = vmatpush3.msra.mxu1 %v1252_v4  ;;  %2471 = vmatpush3.msra.mxu0 %v3113_v26 }
  0x9b   : > { %2461 = vmatprep.subr.mxu1 %v1259_v9  ;;  %2472 = vmatprep.subr.mxu0 %v3125_v33 }
  0x9c   : > { %2462 = vmatpush3.msra.mxu1 %v1259_v9  ;;  %2463 = vmatprep.mubr.f32.mxu1 %v3249_v15 }
  0x9d   : > { %2473 = vmatpush3.msra.mxu0 %v3125_v33  ;;  %2464 = vmatmul.mubr.f32.vlgmr.msra.gmra.mxu1 %v3251_v3 }
  0x9e   : > { %2474 = vmatprep.subr.mxu0 %v3135_v41  ;;  %2501 = vmatprep.subr.mxu1 %v3062_v5 }
  0x9f   : > { %2475 = vmatpush3.msra.mxu0 %v3135_v41  ;;  %2502 = vmatpush3.msra.mxu1 %v3062_v5 }
  0xa0   : > { %2476 = vmatprep.subr.mxu0 %v3167_v59  ;;  %2503 = vmatprep.subr.mxu1 %v3071_v10 }
  0xa1   : > { %2477 = vmatpush3.msra.mxu0 %v3167_v59  ;;  %2504 = vmatpush3.msra.mxu1 %v3071_v10  ;;  %v1958_v59 = vld [vmem:[%s3665_s5] ss:$0 sm:$0xff] }
  0xa2   : > { %2478 = vmatprep.subr.mxu0 %v3175_v2  ;;  %2505 = vmatprep.subr.mxu1 %v3080_v16 }
  0xa3   : > { %2479 = vmatpush3.msra.mxu0 %v3175_v2  ;;  %2506 = vmatpush3.msra.mxu1 %v3080_v16 }
  0xa4   : > { %2480 = vmatprep.subr.mxu0 %v3203_v51  ;;  %2507 = vmatprep.subr.mxu1 %v3092_v20 }
  0xa5   : > { %2481 = vmatpush3.msra.mxu0 %v3203_v51  ;;  %2508 = vmatpush3.msra.mxu1 %v3092_v20 }
  0xa6   : > { %2482 = vmatprep.subr.mxu0 %v3216_v62  ;;  %2509 = vmatprep.subr.mxu1 %v3099_v22 }
  0xa7   : > { %2483 = vmatpush3.msra.mxu0 %v3216_v62  ;;  %2510 = vmatpush3.msra.mxu1 %v3099_v22  ;;  %v1957_v62 = vld [vmem:[%s3663_s3] ss:$0 sm:$0xff] }
  0xa8   : > { %2484 = vmatprep.subr.mxu0 %v3232_v47  ;;  %2511 = vmatprep.subr.mxu1 %v3119_v27 }
  0xa9   : > { %2485 = vmatpush3.msra.mxu0 %v3232_v47  ;;  %2512 = vmatpush3.msra.mxu1 %v3119_v27 }
  0xaa   : > { %2486 = vmatprep.subr.mxu0 %v3247_v14  ;;  %2513 = vmatprep.subr.mxu1 %v3129_v34 }
  0xab   : > { %2487 = vmatpush3.msra.mxu0 %v3247_v14  ;;  %2514 = vmatpush3.msra.mxu1 %v3129_v34 }
  0xac   : > { %2488 = vmatprep.subr.mxu0 %v3264_v23  ;;  %2515 = vmatprep.subr.mxu1 %v3158_v53 }
  0xad   : > { %2489 = vmatpush3.msra.mxu0 %v3264_v23  ;;  %2516 = vmatpush3.msra.mxu1 %v3158_v53 }
  0xae   : > { %2490 = vmatprep.subr.mxu0 %v3282_v7  ;;  %2517 = vmatprep.subr.mxu1 %v3181_v28 }
  0xaf   : > { %2491 = vmatpush3.msra.mxu0 %v3282_v7  ;;  %2518 = vmatpush3.msra.mxu1 %v3181_v28 }
  0xb0   : > { %2492 = vmatprep.subr.mxu0 %v3300_v50  ;;  %2519 = vmatprep.subr.mxu1 %v3185_v31 }
  0xb1   : > { %2493 = vmatpush3.msra.mxu0 %v3300_v50  ;;  %2520 = vmatpush3.msra.mxu1 %v3185_v31 }
  0xb2   : > { %2494 = vmatprep.subr.mxu0 %v3312_v30  ;;  %2521 = vmatprep.subr.mxu1 %v3213_v60 }
  0xb3   : > { %2495 = vmatpush3.msra.mxu0 %v3312_v30  ;;  %2522 = vmatpush3.msra.mxu1 %v3213_v60 }
  0xb4   : > { %2496 = vmatprep.subr.mxu0 %v3322_v1  ;;  %2523 = vmatprep.subr.mxu1 %v3220_v8 }
  0xb5   : > { %2497 = vmatpush3.msra.mxu0 %v3322_v1  ;;  %2498 = vmatprep.mubr.f32.mxu0 %v3279_v58 }
  0xb6   : > { %2524 = vmatpush3.msra.mxu1 %v3220_v8  ;;  %2499 = vmatmul.mubr.f32.vlgmr.msra.gmra.mxu0 %v3288_v32 }
  0xb7   : > { %2525 = vmatprep.subr.mxu1 %v3238_v56  ;;  %2536 = vmatprep.subr.mxu0 %v3107_v24 }
  0xb8   : > { %2526 = vmatpush3.msra.mxu1 %v3238_v56  ;;  %2537 = vmatpush3.msra.mxu0 %v3107_v24 }
  0xb9   : > { %2527 = vmatprep.subr.mxu1 %v3267_v39  ;;  %2538 = vmatprep.subr.mxu0 %v3122_v29 }
  0xba   : > { %2528 = vmatpush3.msra.mxu1 %v3267_v39  ;;  %2539 = vmatpush3.msra.mxu0 %v3122_v29 }
  0xbb   : > { %2529 = vmatprep.subr.mxu1 %v3285_v13  ;;  %2540 = vmatprep.subr.mxu0 %v3142_v45 }
  0xbc   : > { %2530 = vmatpush3.msra.mxu1 %v3285_v13  ;;  %2541 = vmatpush3.msra.mxu0 %v3142_v45 }
  0xbd   : > { %2531 = vmatprep.subr.mxu1 %v3297_v44  ;;  %2542 = vmatprep.subr.mxu0 %v3161_v54 }
  0xbe   : > { %2532 = vmatpush3.msra.mxu1 %v3297_v44  ;;  %2533 = vmatprep.mubr.f32.mxu1 %v3675_v19 }
  0xbf   : > { %2543 = vmatpush3.msra.mxu0 %v3161_v54  ;;  %2534 = vmatmul.mubr.f32.vlgmr.msra.gmra.mxu1 %v3676_v21 }
  0xc0   : > { %2544 = vmatprep.subr.mxu0 %v3172_v61  ;;  %2571 = vmatprep.subr.mxu1 %v3062_v5 }
  0xc1   : > { %2545 = vmatpush3.msra.mxu0 %v3172_v61  ;;  %2572 = vmatpush3.msra.mxu1 %v3062_v5 }
  0xc2   : > { %2546 = vmatprep.subr.mxu0 %v3197_v49  ;;  %2573 = vmatprep.subr.mxu1 %v3071_v10 }
  0xc3   : > { %2547 = vmatpush3.msra.mxu0 %v3197_v49  ;;  %2574 = vmatpush3.msra.mxu1 %v3071_v10 }
  0xc4   : > { %2548 = vmatprep.subr.mxu0 %v3210_v42  ;;  %2575 = vmatprep.subr.mxu1 %v3080_v16 }
  0xc5   : > { %2549 = vmatpush3.msra.mxu0 %v3210_v42  ;;  %2576 = vmatpush3.msra.mxu1 %v3080_v16 }
  0xc6   : > { %2550 = vmatprep.subr.mxu0 %v3229_v38  ;;  %2577 = vmatprep.subr.mxu1 %v3092_v20 }
  0xc7   : > { %2551 = vmatpush3.msra.mxu0 %v3229_v38  ;;  %2578 = vmatpush3.msra.mxu1 %v3092_v20 }
  0xc8   : > { %2552 = vmatprep.subr.mxu0 %v3241_v63  ;;  %2579 = vmatprep.subr.mxu1 %v3099_v22 }
  0xc9   : > { %2553 = vmatpush3.msra.mxu0 %v3241_v63  ;;  %2580 = vmatpush3.msra.mxu1 %v3099_v22 }
  0xca   : > { %2554 = vmatprep.subr.mxu0 %v3258_v11  ;;  %2581 = vmatprep.subr.mxu1 %v3119_v27 }
  0xcb   : > { %2555 = vmatpush3.msra.mxu0 %v3258_v11  ;;  %2582 = vmatpush3.msra.mxu1 %v3119_v27 }
  0xcc   : > { %2556 = vmatprep.subr.mxu0 %v3273_v46  ;;  %2583 = vmatprep.subr.mxu1 %v3129_v34 }
  0xcd   : > { %2557 = vmatpush3.msra.mxu0 %v3273_v46  ;;  %2584 = vmatpush3.msra.mxu1 %v3129_v34 }
  0xce   : > { %2558 = vmatprep.subr.mxu0 %v3294_v40  ;;  %2585 = vmatprep.subr.mxu1 %v3158_v53 }
  0xcf   : > { %2559 = vmatpush3.msra.mxu0 %v3294_v40  ;;  %2586 = vmatpush3.msra.mxu1 %v3158_v53 }
  0xd0   : > { %2560 = vmatprep.subr.mxu0 %v3307_v12  ;;  %2587 = vmatprep.subr.mxu1 %v3181_v28 }
  0xd1   : > { %2561 = vmatpush3.msra.mxu0 %v3307_v12  ;;  %2588 = vmatpush3.msra.mxu1 %v3181_v28 }
  0xd2   : > { %2562 = vmatprep.subr.mxu0 %v3319_v57  ;;  %2589 = vmatprep.subr.mxu1 %v3185_v31 }
  0xd3   : > { %2563 = vmatpush3.msra.mxu0 %v3319_v57  ;;  %2590 = vmatpush3.msra.mxu1 %v3185_v31 }
  0xd4   : > { %2564 = vmatprep.subr.mxu0 %v3335_v43  ;;  %2591 = vmatprep.subr.mxu1 %v3213_v60 }
  0xd5   : > { %2565 = vmatpush3.msra.mxu0 %v3335_v43  ;;  %2592 = vmatpush3.msra.mxu1 %v3213_v60 }
  0xd6   : > { %2566 = vmatprep.subr.mxu0 %v3342_v35  ;;  %2593 = vmatprep.subr.mxu1 %v3220_v8 }
  0xd7   : > { %2567 = vmatpush3.msra.mxu0 %v3342_v35  ;;  %2568 = vmatprep.mubr.f32.mxu0 %v3249_v15 }
  0xd8   : > { %2594 = vmatpush3.msra.mxu1 %v3220_v8  ;;  %2569 = vmatmul.mubr.f32.vlgmr.msra.gmra.mxu0 %v3251_v3 }
  0xd9   : > { %2595 = vmatprep.subr.mxu1 %v3238_v56  ;;  %2603 = vmatprep.mubr.f32.mxu1 %v3249_v15 }
  0xda   : > { %2596 = vmatpush3.msra.mxu1 %v3238_v56 }
  0xdb   : > { %2597 = vmatprep.subr.mxu1 %v3267_v39 }
  0xdc   : > { %2598 = vmatpush3.msra.mxu1 %v3267_v39 }
  0xdd   : > { %2599 = vmatprep.subr.mxu1 %v3285_v13 }
  0xde   : > { %2600 = vmatpush3.msra.mxu1 %v3285_v13 }
  0xdf   : > { %2601 = vmatprep.subr.mxu1 %v3297_v44 }
  0xe0   : > { %2602 = vmatpush3.msra.mxu1 %v3297_v44 }
  0xe1   : > { %2604 = vmatmul.mubr.f32.vlgmr.msra.gmra.mxu1 %v3251_v3 }
  0xef   : > { %v2220_v5 = vpop.f32.mrf.mxu0 }
  0xf0   : > { %v435_v56 = vadd.f32 %v2220_v5, %v1957_v62 }
  0xf1   : > { %v424_v10 = vpop.f32.mrf.mxu0 }
  0xf2   : > { %v425_v63 = vadd.f32 %v1957_v62, %v424_v10 }
  0xf7   : > { %v2255_v16 = vpop.f32.mrf.mxu1 }
  0xf8   : > { %v592_v46 = vadd.f32 %v2255_v16, %v435_v56 }
  0xf9   : > { %v585_v22 = vpop.f32.mrf.mxu1 }
  0xfa   : > { %v586_v58 = vadd.f32 %v585_v22, %v425_v63 }
 0x110   : > { %v2290_v20 = vpop.f32.mrf.mxu0 }
 0x111   : > { %v703_v32 = vadd.f32 %v2290_v20, %v592_v46  ;;  %v3544_v20 = vadd.s32 8, %v3533_v48  ;;  %v3586_v46 = vld [vmem:[%s3666_s6] sm:$0xff] }
 0x112   : > { %v695_v24 = vpop.f32.mrf.mxu0 }
 0x113   : > { %v696_v40 = vadd.f32 %v695_v24, %v586_v58  ;;  %vm307_vm4 = vcmp.eq.s32.totalorder %v3544_v20, 15 }
 0x119   : > { %v2325_v26 = vpop.f32.mrf.mxu1 }
 0x11a   : > { %v800_v50 = vadd.f32 %v2325_v26, %v703_v32 }
 0x11b   : > { %v791_v29 = vpop.f32.mrf.mxu1 }
 0x11c   : > { %v792_v6 = vadd.f32 %v791_v29, %v696_v40 }
 0x132   : > { %v2360_v27 = vpop.f32.mrf.mxu0 }
 0x133   : > { %v925_v18 = vadd.f32 %v2360_v27, %v800_v50 }
 0x134   : > { %v918_v33 = vpop.f32.mrf.mxu0 }
 0x135   : > { %v919_v30 = vadd.f32 %v918_v33, %v792_v6 }
 0x13b   : > { %v2395_v34 = vpop.f32.mrf.mxu1 }
 0x13c   : > { %v3510_v57 = vadd.f32 %v2395_v34, %v925_v18 }
 0x13d   : > { %v1011_v45 = vpop.f32.mrf.mxu1 }
 0x13e   : > { %v3512_v1 = vadd.f32 %v1011_v45, %v919_v30 }
 0x155   : > { %v2430_v41 = vpop.f32.mrf.mxu0 }
 0x156   : > { %v1146_v42 = vadd.f32 %v2430_v41, %v1958_v59 }
 0x157   : > { %v1135_v53 = vpop.f32.mrf.mxu0 }
 0x158   : > { %v1136_v28 = vadd.f32 %v1958_v59, %v1135_v53 }
 0x15d   : > { %v2465_v54 = vpop.f32.mrf.mxu1 }
 0x15e   : > { %v1303_v14 = vadd.f32 %v2465_v54, %v1146_v42 }
 0x15f   : > { %v1296_v2 = vpop.f32.mrf.mxu1 }
 0x160   : > { %v1297_v60 = vadd.f32 %v1296_v2, %v1136_v28 }
 0x176   : > { %v2500_v61 = vpop.f32.mrf.mxu0 }
 0x177   : > { %v1414_v11 = vadd.f32 %v2500_v61, %v1303_v14  ;;  %v3575_v14 = vld [vmem:[%s3666_s6 + $0x8] sm:$0xff] }
 0x178   : > { %v1406_v31 = vpop.f32.mrf.mxu0 }
 0x179   : > { %v1407_v38 = vadd.f32 %v1406_v31, %v1297_v60 }
 0x17f   : > { %v2535_v49 = vpop.f32.mrf.mxu1 }
 0x180   : > { %v1511_v7 = vadd.f32 %v2535_v49, %v1414_v11 }
 0x181   : > { %v1502_v8 = vpop.f32.mrf.mxu1 }
 0x182   : > { %v1503_v15 = vadd.f32 %v1502_v8, %v1407_v38 }
 0x198   : > { %v2570_v51 = vpop.f32.mrf.mxu0 }
 0x199   : > { %v1636_v44 = vadd.f32 %v2570_v51, %v1511_v7 }
 0x19a   : > { %v1629_v47 = vpop.f32.mrf.mxu0 }
 0x19b   : > { %v1630_v23 = vadd.f32 %v1629_v47, %v1503_v15 }
 0x1a1   : > { %v2605_v3 = vpop.f32.mrf.mxu1 }
 0x1a2   : > { %v3504_v12 = vadd.f32 %v2605_v3, %v1636_v44 }
 0x1a3   : > { %v1722_v39 = vpop.f32.mrf.mxu1 }
 0x1a4   : > { %v3498_v13 = vadd.f32 %v1722_v39, %v1630_v23 }
 0x1a6   : > { %1740 = vrot.lane.b32.xlu1 %v3498_v13, %s2624_s17  ;;  %1732 = vrot.lane.b32.xlu0 %v3498_v13, %s2625_s18 }
 0x1aa   : > { %1742 = vrot.lane.b32.xlu1 %v3504_v12, %s2624_s17  ;;  %1734 = vrot.lane.b32.xlu0 %v3504_v12, %s2625_s18 }
 0x1ae   : > { %1774 = vrot.lane.b32.xlu1 %v3510_v57, %s2625_s18  ;;  %1772 = vrot.lane.b32.xlu0 %v3512_v1, %s2625_s18 }
 0x1b2   : > { %1780 = vrot.lane.b32.xlu1 %v3510_v57, %s2624_s17  ;;  %1778 = vrot.lane.b32.xlu0 %v3512_v1, %s2624_s17 }
 0x218   : > { %v1741_v43 = vpop.permute.xlu1 %1740  ;;  %v1733_v52 = vpop.permute.xlu0 %1732 }
 0x219   : > { %v1844_v36 = vsel %vm305_vm0, -1e+30, %v1741_v43  ;;  %v1736_v35 = vsel %vm304_vm1, 0.0, %v1733_v52  ;;  %v1842_v0 = vsel %vm304_vm1, -1e+30, %v1733_v52  ;;  %v1744_v19 = vsel %vm305_vm0, 0.0, %v1741_v43 }
 0x21a   : > { %v1738_v55 = vadd.f32 %v1736_v35, %v3498_v13  ;;  %v1846_v37 = vmax.f32 %v1842_v0, %v1844_v36 }
 0x21c   : > { %v1743_v4 = vpop.permute.xlu1 %1742  ;;  %v1735_v9 = vpop.permute.xlu0 %1734  ;;  %v1746_v16 = vadd.f32 %v1744_v19, %v1738_v55  ;;  %v1848_v26 = vmax.f32 %v3498_v13, %v1846_v37 }
 0x21d   : > { %v1845_v21 = vsel %vm305_vm0, -1e+30, %v1743_v4  ;;  %v1737_v5 = vsel %vm304_vm1, 0.0, %v1735_v9  ;;  %v1843_v10 = vsel %vm304_vm1, -1e+30, %v1735_v9  ;;  %v1745_v27 = vsel %vm305_vm0, 0.0, %v1743_v4 }
 0x21e   : > { %v1739_v22 = vadd.f32 %v1737_v5, %v3504_v12  ;;  %v1847_v24 = vmax.f32 %v1843_v10, %v1845_v21  ;;  %v1748_v45 = vrot.slane %v1746_v16, 1  ;;  %v1757_v53 = vrot.slane %v1746_v16, 7 }
 0x21f   : > { %v1850_v28 = vrot.slane %v1848_v26, 1  ;;  %v1856_v31 = vrot.slane %v1848_v26, 7 }
 0x220   : > { %v1775_v29 = vpop.permute.xlu1 %1774  ;;  %v1747_v33 = vadd.f32 %v1745_v27, %v1739_v22  ;;  %v1849_v34 = vmax.f32 %v3504_v12, %v1847_v24  ;;  %v1773_v41 = vpop.permute.xlu0 %1772 }
 0x221   : > { %v1777_v49 = vsel %vm304_vm1, -1e+30, %v1775_v29  ;;  %v1776_v52 = vsel %vm304_vm1, -1e+30, %v1773_v41 }
 0x222   : > { %v1749_v54 = vrot.slane %v1747_v33, 1  ;;  %v1758_v59 = vrot.slane %v1747_v33, 7  ;;  %v1851_v61 = vrot.slane %v1849_v34, 1  ;;  %v1857_v2 = vrot.slane %v1849_v34, 7 }
 0x224   : > { %v1751_v51 = vsel %vm1750_vm3, %v1748_v45, %v1749_v54  ;;  %v1752_v42 = vsel %vm1750_vm3, %v1749_v54, %v1748_v45  ;;  %v1760_v60 = vsel %vm1759_vm5, %v1757_v53, %v1758_v59  ;;  %v1761_v62 = vsel %vm1759_vm5, %v1758_v59, %v1757_v53  ;;  %v1781_v8 = vpop.permute.xlu1 %1780  ;;  %v1779_v39 = vpop.permute.xlu0 %1778 }
 0x225   : > { %v1754_v38 = vsel %vm307_vm4, 0.0, %v1752_v42  ;;  %v1755_v47 = vadd.f32 %v1751_v51, %v1746_v16  ;;  %v1762_v56 = vsel %vm308_vm2, 0.0, %v1761_v62  ;;  %v1852_v63 = vsel %vm1750_vm3, %v1850_v28, %v1851_v61 }
 0x226   : > { %v1756_v15 = vadd.f32 %v1754_v38, %v1747_v33  ;;  %v1853_v3 = vsel %vm1750_vm3, %v1851_v61, %v1850_v28  ;;  %v1858_v11 = vsel %vm1759_vm5, %v1856_v31, %v1857_v2  ;;  %v1859_v23 = vsel %vm1759_vm5, %v1857_v2, %v1856_v31 }
 0x227   : > { %v1764_v58 = vadd.f32 %v1762_v56, %v1755_v47  ;;  %v1855_v7 = vsel %vm307_vm4, -1e+30, %v1853_v3  ;;  %v1860_v32 = vsel %vm308_vm2, -1e+30, %v1859_v23  ;;  %v1783_v40 = vsel %vm305_vm0, -1e+30, %v1781_v8 }
 0x228   : > { %v1765_v44 = vadd.f32 %v1760_v60, %v1756_v15  ;;  %v1862_v50 = vmax.f32 %v1852_v63, %v1860_v32  ;;  %v1863_v6 = vmax.f32 %v1855_v7, %v1858_v11  ;;  %v1785_v18 = vmax.f32 %v1777_v49, %v1783_v40 }
 0x229   : > { %v1782_v30 = vsel %vm305_vm0, -1e+30, %v1779_v39  ;;  %v1768_v17 = vmul.f32 %v3586_v46, %v1764_v58 }
 0x22a   : > { %v1769_v43 = vmul.f32 %v3575_v14, %v1765_v44  ;;  %v1787_v36 = vmax.f32 %v3510_v57, %v1785_v18  ;;  %v1864_v35 = vmax.f32 %v1848_v26, %v1862_v50  ;;  %v1784_v0 = vmax.f32 %v1776_v52, %v1782_v30 }
 0x22b   : > { %v1770_v55 = vadd.f32 %v1768_v17, %v3512_v1  ;;  %v1865_v4 = vmax.f32 %v1849_v34, %v1863_v6 }
 0x22c   : > { %v1771_v37 = vadd.f32 %v1769_v43, %v3510_v57  ;;  %v1789_v9 = vrot.slane %v1787_v36, 1  ;;  %v1795_v19 = vrot.slane %v1787_v36, 7  ;;  %v1786_v21 = vmax.f32 %v3512_v1, %v1784_v0 }
 0x22d   : > { %1806 = vrot.lane.b32.xlu0 %v1770_v55, %s2625_s18  ;;  %v1866_v5 = vadd.f32 %v1864_v35, %v1770_v55  ;;  %1868 = vst [vmem:[%s3600_s27] sm:$0xff] %v1770_v55 }
 0x22e   : > { %v1867_v10 = vadd.f32 %v1865_v4, %v1771_v37  ;;  %1869 = vst [vmem:[%s3600_s27 + $0x8] sm:$0xff] %v1771_v37  ;;  %1808 = vrot.lane.b32.xlu1 %v1771_v37, %s2625_s18  ;;  %v1788_v16 = vrot.slane %v1786_v21, 1  ;;  %v1794_v22 = vrot.slane %v1786_v21, 7 }
 0x22f   : > { %1963 = vst [vmem:[%s3600_s27 + $0x30] sm:$0xff] %v1866_v5 }
 0x230   : > { %1964 = vst [vmem:[%s3600_s27 + $0x38] sm:$0xff] %v1867_v10  ;;  %v1790_v57 = vsel %vm1750_vm3, %v1788_v16, %v1789_v9  ;;  %v1791_v1 = vsel %vm1750_vm3, %v1789_v9, %v1788_v16  ;;  %v1796_v24 = vsel %vm1759_vm5, %v1794_v22, %v1795_v19  ;;  %v1797_v26 = vsel %vm1759_vm5, %v1795_v19, %v1794_v22 }
 0x231   : > { %1814 = vrot.lane.b32.xlu0 %v1770_v55, %s2624_s17  ;;  %v1793_v27 = vsel %vm307_vm4, -1e+30, %v1791_v1  ;;  %v1798_v29 = vsel %vm308_vm2, -1e+30, %v1797_v26 }
 0x232   : > { %1816 = vrot.lane.b32.xlu1 %v1771_v37, %s2624_s17  ;;  %v1800_v33 = vmax.f32 %v1790_v57, %v1798_v29  ;;  %v1801_v34 = vmax.f32 %v1793_v27, %v1796_v24 }
 0x234   : > { %v1802_v41 = vmax.f32 %v1786_v21, %v1800_v33  ;;  %v1803_v45 = vmax.f32 %v1787_v36, %v1801_v34 }
 0x236   : > { %v1804_v53 = vadd.f32 %v1802_v41, %v3498_v13  ;;  %v1805_v54 = vadd.f32 %v1803_v45, %v3504_v12 }
 0x238   : > { %1959 = vst [vmem:[%s3600_s27 + $0x10] sm:$0xff] %v1804_v53  ;;  %1960 = vst [vmem:[%s3600_s27 + $0x18] sm:$0xff] %v1805_v54 }
 0x29f   : > { %v1807_v59 = vpop.permute.xlu0 %1806 }
 0x2a0   : > { %v1810_v61 = vsel %vm304_vm1, 0.0, %v1807_v59  ;;  %v1809_v2 = vpop.permute.xlu1 %1808 }
 0x2a1   : > { %v1811_v28 = vsel %vm304_vm1, 0.0, %v1809_v2  ;;  %v1812_v31 = vadd.f32 %v1810_v61, %v1770_v55 }
 0x2a2   : > { %v1813_v51 = vadd.f32 %v1811_v28, %v1771_v37 }
 0x2a3   : > { %v1815_v49 = vpop.permute.xlu0 %1814 }
 0x2a4   : > { %v1818_v42 = vsel %vm305_vm0, 0.0, %v1815_v49  ;;  %v1817_v60 = vpop.permute.xlu1 %1816 }
 0x2a5   : > { %v1820_v13 = vadd.f32 %v1818_v42, %v1812_v31  ;;  %v1819_v12 = vsel %vm305_vm0, 0.0, %v1817_v60 }
 0x2a6   : > { %v1821_v62 = vadd.f32 %v1819_v12, %v1813_v51 }
 0x2a7   : > { %v1822_v8 = vrot.slane %v1820_v13, 1  ;;  %v1830_v38 = vrot.slane %v1820_v13, 7 }
 0x2a8   : > { %v1823_v47 = vrot.slane %v1821_v62, 1  ;;  %v1831_v56 = vrot.slane %v1821_v62, 7 }
 0x2aa   : > { %v1824_v63 = vsel %vm1750_vm3, %v1822_v8, %v1823_v47  ;;  %v1825_v15 = vsel %vm1750_vm3, %v1823_v47, %v1822_v8  ;;  %v1833_v3 = vsel %vm1759_vm5, %v1831_v56, %v1830_v38  ;;  %v1832_v58 = vsel %vm1759_vm5, %v1830_v38, %v1831_v56 }
 0x2ab   : > { %v1827_v25 = vsel %vm307_vm4, 0.0, %v1825_v15  ;;  %v1828_v11 = vadd.f32 %v1824_v63, %v1820_v13  ;;  %v1834_v23 = vsel %vm308_vm2, 0.0, %v1833_v3 }
 0x2ac   : > { %v1829_v39 = vadd.f32 %v1827_v25, %v1821_v62 }
 0x2ad   : > { %v1836_v7 = vadd.f32 %v1834_v23, %v1828_v11 }
 0x2ae   : > { %v1837_v32 = vadd.f32 %v1832_v58, %v1829_v39 }
 0x2af   : > { %v1838_v40 = vmul.f32 %v1836_v7, %v3586_v46 }
 0x2b0   : > { %v1839_v44 = vmul.f32 %v1837_v32, %v3575_v14 }
 0x2b1   : > { %v1840_v50 = vadd.f32 %v1838_v40, %v1804_v53 }
 0x2b2   : > { %v1841_v6 = vadd.f32 %v1839_v44, %v1805_v54 }
 0x2b3   : > { %1961 = vst [vmem:[%s3600_s27 + $0x20] sm:$0xff] %v1840_v50 }
 0x2b4   : > { %1962 = vst [vmem:[%s3600_s27 + $0x28] sm:$0xff] %v1841_v6 }
 0x2b5 PF: > { %s17_s24 = sadd.s32 1, %s2622_s24  }
 0x2b6   : > { %p14_p4 = scmp.ge.s32.totalorder %s17_s24, 4  }
 0x2b8   :  { %16 = sbr.rel (!%p14_p4) target bundleno = 1 (0x1), region = 84 }

</bundles_post_ra>
